<compile_context>
chip_gen: v6e
topology: v6e:2x2x1
jax: 0.10.0
libtpu: 0.0.40
codegen_flags: <defaults>
</compile_context>

<pallas_src>
import functools
import numpy as np
import jax
import jax.numpy as jnp
from jax import lax
from jax.experimental import pallas as pl
from jax.experimental.pallas import tpu as pltpu


LAYER_KEYS = ("qkv_w", "qkv_b", "o_w", "o_b",
              "ff1_w", "ff1_b", "ff2_w", "ff2_b",
              "ln1_g", "ln1_b", "ln2_g", "ln2_b")

_SQRT1_2 = np.float32(1.0 / np.sqrt(2.0))
_NEG_INF = np.float32(-1e9)


# ----------------------------------------------------------- in-kernel math --

def _gelu(x):
    # exact (erf) gelu, matches torch.nn.functional.gelu default
    return 0.5 * x * (1.0 + lax.erf(x * _SQRT1_2))


def _silu(x):
    return x * jax.nn.sigmoid(x)


def _layernorm(x, g, b, eps=1e-5):
    mu = jnp.mean(x, axis=-1, keepdims=True)
    var = jnp.mean(jnp.square(x - mu), axis=-1, keepdims=True)
    return (x - mu) * lax.rsqrt(var + eps) * g + b


def _linear(x, w, b, act=None):
    y = jnp.dot(x, w, preferred_element_type=jnp.float32) + b
    if act == "gelu":
        y = _gelu(y)
    elif act == "silu":
        y = _silu(y)
    return y


def _encoder_layer(x, layer_refs, l, mask, head_masks, *, D, H):
    """Post-LN nn.TransformerEncoderLayer (eval mode) on a (rows, D) slab.

    `mask` is an additive (rows, rows) block-diagonal bias keeping batch
    elements from attending to each other.  `head_masks[h]` is a (1, D) 0/1
    lane mask selecting head h's feature block, so per-head score / context
    matmuls contract the full D axis (no lane slicing) and concat(heads)@W_o
    is a single matmul.
    """
    hd = D // H
    scale = np.float32(1.0 / np.sqrt(hd))
    p = {k: layer_refs[k][l] for k in LAYER_KEYS}            # static layer index

    # packed QKV projection: one MXU pass over x
    qkv = _linear(x, p["qkv_w"], p["qkv_b"])                 # (R, 3D)
    q = qkv[:, :D]
    k = qkv[:, D:2 * D]
    v = qkv[:, 2 * D:]

    concat = None                                            # heads concatenated by lanes
    for h in range(H):                                       # small static unroll
        hm = head_masks[h]                                   # (1, D) 0/1
        # q_h @ k_h^T  ==  (q*hm) contracted with k over the full D axis
        s = lax.dot_general(q * hm, k, (((1,), (1,)), ((), ())),
                            preferred_element_type=jnp.float32) * scale + mask
        m = jnp.max(s, axis=-1, keepdims=True)
        e = jnp.exp(s - m)
        # softmax denominator reciprocal on the EUP slot
        pr = e * pl.reciprocal(jnp.sum(e, axis=-1, keepdims=True), approx=True)
        # p_h @ (v*hm): head-h lanes hold p_h@v_h, all other lanes are zero
        oh = jnp.dot(pr, v * hm, preferred_element_type=jnp.float32)        # (R, D)
        concat = oh if concat is None else concat + oh
    attn = jnp.dot(concat, p["o_w"], preferred_element_type=jnp.float32) + p["o_b"]

    x1 = _layernorm(x + attn, p["ln1_g"], p["ln1_b"])
    h1 = _linear(x1, p["ff1_w"], p["ff1_b"], act="gelu")
    h2 = _linear(h1, p["ff2_w"], p["ff2_b"])
    return _layernorm(x1 + h2, p["ln2_g"], p["ln2_b"])


# ------------------------------------------------------------- fused kernel --

def _fused_forward_kernel(*refs, B, L, Lc, S, D, H, n_dis, n_seq):
    (fluent_ref, dis_ref, tpe_ref, pe_ref, dmask_ref, smask_ref,
     sel_t_ref, sel_d_ref, sel_f_ref, gather_ref,
     fe_w, fe_b, de_w, de_b, t1_w, t1_b, t2_w, t2_b, pp_w, pp_b,
     *stack_refs) = refs[:-1]
    out_ref = refs[-1]
    assert len(stack_refs) == 2 * len(LAYER_KEYS)
    dis_refs = dict(zip(LAYER_KEYS, stack_refs[:len(LAYER_KEYS)]))
    seq_refs = dict(zip(LAYER_KEYS, stack_refs[len(LAYER_KEYS):]))

    # per-head 0/1 lane masks, built once (cheap VPU compares on a 2-D iota)
    hd = D // H
    lane = lax.broadcasted_iota(jnp.int32, (1, D), 1)
    head_masks = [((lane >= h * hd) & (lane < (h + 1) * hd)).astype(jnp.float32)
                  for h in range(H)]

    # fluent_encoder (MotionProcess): per-frame linear K*Dk -> latent
    fluent_emb = _linear(fluent_ref[...], fe_w[...], fe_b[...])          # (B*L, D)

    # DisfluentContextEncoder: MotionProcess -> 2-layer encoder
    xd = _linear(dis_ref[...], de_w[...], de_b[...])                     # (B*Lc, D)
    dmask = dmask_ref[...]
    for l in range(n_dis):
        xd = _encoder_layer(xd, dis_refs, l, dmask, head_masks, D=D, H=H)

    # TimestepEmbedder: pe[t] -> Linear -> SiLU -> Linear
    ht = _linear(tpe_ref[...], t1_w[...], t1_b[...], act="silu")
    t_emb = _linear(ht, t2_w[...], t2_b[...])                            # (B, D)

    # sequence assembly: per batch [t_emb, mean(disfluent ctx), fluent frames],
    # expressed as three scatter/pool matmuls (sel_d already folds the 1/Lc
    # mean pool), plus the batch-tiled sinusoidal positional encoding.
    seq = (jnp.dot(sel_t_ref[...], t_emb, preferred_element_type=jnp.float32)
           + jnp.dot(sel_d_ref[...], xd, preferred_element_type=jnp.float32)
           + jnp.dot(sel_f_ref[...], fluent_emb, preferred_element_type=jnp.float32)
           + pe_ref[...])                                                # (B*S, D)

    # N-layer sequence transformer encoder
    smask = smask_ref[...]
    for l in range(n_seq):
        seq = _encoder_layer(seq, seq_refs, l, smask, head_masks, D=D, H=H)

    # keep last L positions per batch (0/1 gather matmul), then pose projection
    x_out = jnp.dot(gather_ref[...], seq, preferred_element_type=jnp.float32)  # (B*L, D)
    out_ref[...] = _linear(x_out, pp_w[...], pp_b[...])


# --------------------------------------------------------------- model glue --

def make_pe_table(max_len, d_model):
    position = np.arange(max_len, dtype=np.float64)[:, None]
    div_term = np.exp(np.arange(0, d_model, 2, dtype=np.float64)
                      * (-np.log(10000.0) / d_model))
    pe = np.zeros((max_len, d_model), dtype=np.float32)
    pe[:, 0::2] = np.sin(position * div_term)
    pe[:, 1::2] = np.cos(position * div_term)
    return jnp.asarray(pe)


def _block_diag_bias(batch, seqlen):
    """Additive attention bias: 0 within a batch element, -1e9 across elements."""
    m = np.full((batch * seqlen, batch * seqlen), _NEG_INF, dtype=np.float32)
    for b in range(batch):
        m[b * seqlen:(b + 1) * seqlen, b * seqlen:(b + 1) * seqlen] = 0.0
    return jnp.asarray(m)


def _assembly_selectors(B, L, Lc, S):
    """0/1 selection matrices for sequence assembly, mean pool and output gather."""
    sel_t = np.zeros((B * S, B), np.float32)          # scatter t_emb to row b*S
    sel_d = np.zeros((B * S, B * Lc), np.float32)     # mean-pool + scatter to row b*S+1
    sel_f = np.zeros((B * S, B * L), np.float32)      # scatter fluent frames
    gather = np.zeros((B * L, B * S), np.float32)     # take last L positions per batch
    for b in range(B):
        sel_t[b * S, b] = 1.0
        sel_d[b * S + 1, b * Lc:(b + 1) * Lc] = 1.0 / Lc
        for i in range(L):
            sel_f[b * S + 2 + i, b * L + i] = 1.0
            gather[b * L + i, b * S + (S - L) + i] = 1.0
    return (jnp.asarray(sel_t), jnp.asarray(sel_d),
            jnp.asarray(sel_f), jnp.asarray(gather))


# ----------------------------------------------------------- parameter init --

def _init_linear(key, fan_in, fan_out, scale=0.02):
    kw, kb = jax.random.split(key)
    return (jax.random.normal(kw, (fan_in, fan_out), jnp.float32) * scale,
            jax.random.normal(kb, (1, fan_out), jnp.float32) * scale)


def _init_encoder_layer(key, d, ff):
    ks = jax.random.split(key, 4)
    # TODO(synk): PyTorch MHA uses a packed (3D, D) in_proj; loading a checkpoint
    #             would require splitting/transposing it into this qkv_w layout.
    qkv_w, qkv_b = _init_linear(ks[0], d, 3 * d)
    o_w, o_b = _init_linear(ks[1], d, d)
    ff1_w, ff1_b = _init_linear(ks[2], d, ff)
    ff2_w, ff2_b = _init_linear(ks[3], ff, d)
    return {
        "qkv_w": qkv_w, "qkv_b": qkv_b, "o_w": o_w, "o_b": o_b,
        "ff1_w": ff1_w, "ff1_b": ff1_b, "ff2_w": ff2_w, "ff2_b": ff2_b,
        "ln1_g": jnp.ones((1, d), jnp.float32), "ln1_b": jnp.zeros((1, d), jnp.float32),
        "ln2_g": jnp.ones((1, d), jnp.float32), "ln2_b": jnp.zeros((1, d), jnp.float32),
    }


def _stack_layers(layers):
    return {k: jnp.stack([lyr[k] for lyr in layers], axis=0) for k in LAYER_KEYS}


def init_model_params(key, input_feats, latent_dim, ff_size, num_layers,
                      dis_layers=2, max_len=5000):
    ks = jax.random.split(key, 7)
    return {
        "fluent_encoder": _init_linear(ks[0], input_feats, latent_dim),
        "dis_pose_encoder": _init_linear(ks[1], input_feats, latent_dim),
        "dis_layers": _stack_layers(
            [_init_encoder_layer(k, latent_dim, latent_dim * 4)
             for k in jax.random.split(ks[2], dis_layers)]),
        "time_mlp1": _init_linear(ks[3], latent_dim, latent_dim),
        "time_mlp2": _init_linear(ks[4], latent_dim, latent_dim),
        "seq_layers": _stack_layers(
            [_init_encoder_layer(k, latent_dim, ff_size)
             for k in jax.random.split(ks[5], num_layers)]),
        "pose_projection": _init_linear(ks[6], latent_dim, input_feats),
        "pe": make_pe_table(max_len, latent_dim),
    }


# ------------------------------------------------------------------ forward --

def sign_language_pose_diffusion_forward(params, fluent_clip, disfluent_seq, t,
                                         *, num_heads):
    # fluent_clip: (B, L, 1, K, Dk)   disfluent_seq: (B, Lc, 1, K, Dk)   t: (B,) int32
    B, L, _, K, Dk = fluent_clip.shape
    Lc = disfluent_seq.shape[1]
    D = params["pe"].shape[1]
    F = K * Dk
    S = 2 + L                                  # [t_emb, dis_ctx, fluent frames]

    fluent_flat = fluent_clip.reshape(B * L, F).astype(jnp.float32)
    dis_flat = disfluent_seq.reshape(B * Lc, F).astype(jnp.float32)
    t_pe = jnp.take(params["pe"], t, axis=0)                 # (B, D) timestep PE rows
    pe_tiled = jnp.tile(params["pe"][:S], (B, 1))            # (B*S, D) batch-tiled seq PE

    dis_mask = _block_diag_bias(B, Lc)                       # (B*Lc, B*Lc)
    seq_mask = _block_diag_bias(B, S)                        # (B*S, B*S)
    sel_t, sel_d, sel_f, gather = _assembly_selectors(B, L, Lc, S)

    inputs = [fluent_flat, dis_flat, t_pe, pe_tiled, dis_mask, seq_mask,
              sel_t, sel_d, sel_f, gather]
    for name in ("fluent_encoder", "dis_pose_encoder",
                 "time_mlp1", "time_mlp2", "pose_projection"):
        inputs.extend(params[name])
    inputs.extend(params["dis_layers"][k] for k in LAYER_KEYS)
    inputs.extend(params["seq_layers"][k] for k in LAYER_KEYS)

    n_dis = params["dis_layers"]["qkv_w"].shape[0]
    n_seq = params["seq_layers"]["qkv_w"].shape[0]

    kernel = functools.partial(
        _fused_forward_kernel, B=B, L=L, Lc=Lc, S=S, D=D, H=num_heads,
        n_dis=n_dis, n_seq=n_seq)

    def _full_spec(a):
        return pl.BlockSpec(a.shape, lambda i, _nd=a.ndim: (0,) * _nd)

    out = pl.pallas_call(
        kernel,
        grid=(1,),                                            # everything fits in VMEM
        in_specs=[_full_spec(a) for a in inputs],
        out_specs=pl.BlockSpec((B * L, F), lambda i: (0, 0)),
        out_shape=jax.ShapeDtypeStruct((B * L, F), jnp.float32),
        compiler_params=pltpu.CompilerParams(
            dimension_semantics=("arbitrary",)),
    )(*inputs)
    return out.reshape(B, L, K, Dk)


# --------------------------------------------------------------------- main --

if __name__ == "__main__":
    # small, module-consistent shapes
    B, L_target, L_cond = 2, 8, 6
    people, keypoints, dims = 1, 4, 2
    input_feats = keypoints * dims
    latent_dim, ff_size, num_layers, num_heads = 32, 64, 2, 4

    key = jax.random.PRNGKey(0)
    k_par, k_fc, k_ds, k_t = jax.random.split(key, 4)

    params = init_model_params(k_par, input_feats, latent_dim, ff_size, num_layers)

    fluent_clip = jax.random.normal(
        k_fc, (B, L_target, people, keypoints, dims), jnp.float32)
    disfluent_seq = jax.random.normal(
        k_ds, (B, L_cond, people, keypoints, dims), jnp.float32)
    t = jax.random.randint(k_t, (B,), 0, 1000, dtype=jnp.int32)

    fwd = jax.jit(functools.partial(sign_language_pose_diffusion_forward,
                                    num_heads=num_heads))
    out = fwd(params, fluent_clip, disfluent_seq, t)
    jax.block_until_ready(out)
    assert out.shape == (B, L_target, keypoints, dims)
    assert bool(jnp.all(jnp.isfinite(out)))
    # TODO(synk): dropout layers are treated as eval-mode identities (no RNG masking).
    print("KERNEL_OK")
</pallas_src>

<mosaic_0001>
module attributes {stable_mosaic.version = 11 : i64} {
  func.func @_fused_forward_kernel(%arg0: i32, %arg1: memref<16x8xf32, #tpu.memory_space<vmem>>, %arg2: memref<12x8xf32, #tpu.memory_space<vmem>>, %arg3: memref<2x32xf32, #tpu.memory_space<vmem>>, %arg4: memref<20x32xf32, #tpu.memory_space<vmem>>, %arg5: memref<12x12xf32, #tpu.memory_space<vmem>>, %arg6: memref<20x20xf32, #tpu.memory_space<vmem>>, %arg7: memref<20x2xf32, #tpu.memory_space<vmem>>, %arg8: memref<20x12xf32, #tpu.memory_space<vmem>>, %arg9: memref<20x16xf32, #tpu.memory_space<vmem>>, %arg10: memref<16x20xf32, #tpu.memory_space<vmem>>, %arg11: memref<8x32xf32, #tpu.memory_space<vmem>>, %arg12: memref<1x32xf32, #tpu.memory_space<vmem>>, %arg13: memref<8x32xf32, #tpu.memory_space<vmem>>, %arg14: memref<1x32xf32, #tpu.memory_space<vmem>>, %arg15: memref<32x32xf32, #tpu.memory_space<vmem>>, %arg16: memref<1x32xf32, #tpu.memory_space<vmem>>, %arg17: memref<32x32xf32, #tpu.memory_space<vmem>>, %arg18: memref<1x32xf32, #tpu.memory_space<vmem>>, %arg19: memref<32x8xf32, #tpu.memory_space<vmem>>, %arg20: memref<1x8xf32, #tpu.memory_space<vmem>>, %arg21: memref<2x32x96xf32, #tpu.memory_space<vmem>>, %arg22: memref<2x1x96xf32, #tpu.memory_space<vmem>>, %arg23: memref<2x32x32xf32, #tpu.memory_space<vmem>>, %arg24: memref<2x1x32xf32, #tpu.memory_space<vmem>>, %arg25: memref<2x32x128xf32, #tpu.memory_space<vmem>>, %arg26: memref<2x1x128xf32, #tpu.memory_space<vmem>>, %arg27: memref<2x128x32xf32, #tpu.memory_space<vmem>>, %arg28: memref<2x1x32xf32, #tpu.memory_space<vmem>>, %arg29: memref<2x1x32xf32, #tpu.memory_space<vmem>>, %arg30: memref<2x1x32xf32, #tpu.memory_space<vmem>>, %arg31: memref<2x1x32xf32, #tpu.memory_space<vmem>>, %arg32: memref<2x1x32xf32, #tpu.memory_space<vmem>>, %arg33: memref<2x32x96xf32, #tpu.memory_space<vmem>>, %arg34: memref<2x1x96xf32, #tpu.memory_space<vmem>>, %arg35: memref<2x32x32xf32, #tpu.memory_space<vmem>>, %arg36: memref<2x1x32xf32, #tpu.memory_space<vmem>>, %arg37: memref<2x32x64xf32, #tpu.memory_space<vmem>>, %arg38: memref<2x1x64xf32, #tpu.memory_space<vmem>>, %arg39: memref<2x64x32xf32, #tpu.memory_space<vmem>>, %arg40: memref<2x1x32xf32, #tpu.memory_space<vmem>>, %arg41: memref<2x1x32xf32, #tpu.memory_space<vmem>>, %arg42: memref<2x1x32xf32, #tpu.memory_space<vmem>>, %arg43: memref<2x1x32xf32, #tpu.memory_space<vmem>>, %arg44: memref<2x1x32xf32, #tpu.memory_space<vmem>>, %arg45: memref<16x8xf32, #tpu.memory_space<vmem>>) attributes {dimension_semantics = [#tpu.dimension_semantics<arbitrary>], iteration_bounds = array<i64: 1>, scalar_prefetch = 0 : i64, scratch_operands = 0 : i64, tpu.core_type = #tpu.core_type<tc>, window_params = [{pipeline_mode = #tpu.pipeline_mode<synchronous>, transform_indices = @transform_0, window_bounds = array<i64: 16, 8>}, {pipeline_mode = #tpu.pipeline_mode<synchronous>, transform_indices = @transform_1, window_bounds = array<i64: 12, 8>}, {pipeline_mode = #tpu.pipeline_mode<synchronous>, transform_indices = @transform_2, window_bounds = array<i64: 2, 32>}, {pipeline_mode = #tpu.pipeline_mode<synchronous>, transform_indices = @transform_3, window_bounds = array<i64: 20, 32>}, {pipeline_mode = #tpu.pipeline_mode<synchronous>, transform_indices = @transform_4, window_bounds = array<i64: 12, 12>}, {pipeline_mode = #tpu.pipeline_mode<synchronous>, transform_indices = @transform_5, window_bounds = array<i64: 20, 20>}, {pipeline_mode = #tpu.pipeline_mode<synchronous>, transform_indices = @transform_6, window_bounds = array<i64: 20, 2>}, {pipeline_mode = #tpu.pipeline_mode<synchronous>, transform_indices = @transform_7, window_bounds = array<i64: 20, 12>}, {pipeline_mode = #tpu.pipeline_mode<synchronous>, transform_indices = @transform_8, window_bounds = array<i64: 20, 16>}, {pipeline_mode = #tpu.pipeline_mode<synchronous>, transform_indices = @transform_9, window_bounds = array<i64: 16, 20>}, {pipeline_mode = #tpu.pipeline_mode<synchronous>, transform_indices = @transform_10, window_bounds = array<i64: 8, 32>}, {pipeline_mode = #tpu.pipeline_mode<synchronous>, transform_indices = @transform_11, window_bounds = array<i64: 1, 32>}, {pipeline_mode = #tpu.pipeline_mode<synchronous>, transform_indices = @transform_12, window_bounds = array<i64: 8, 32>}, {pipeline_mode = #tpu.pipeline_mode<synchronous>, transform_indices = @transform_13, window_bounds = array<i64: 1, 32>}, {pipeline_mode = #tpu.pipeline_mode<synchronous>, transform_indices = @transform_14, window_bounds = array<i64: 32, 32>}, {pipeline_mode = #tpu.pipeline_mode<synchronous>, transform_indices = @transform_15, window_bounds = array<i64: 1, 32>}, {pipeline_mode = #tpu.pipeline_mode<synchronous>, transform_indices = @transform_16, window_bounds = array<i64: 32, 32>}, {pipeline_mode = #tpu.pipeline_mode<synchronous>, transform_indices = @transform_17, window_bounds = array<i64: 1, 32>}, {pipeline_mode = #tpu.pipeline_mode<synchronous>, transform_indices = @transform_18, window_bounds = array<i64: 32, 8>}, {pipeline_mode = #tpu.pipeline_mode<synchronous>, transform_indices = @transform_19, window_bounds = array<i64: 1, 8>}, {pipeline_mode = #tpu.pipeline_mode<synchronous>, transform_indices = @transform_20, window_bounds = array<i64: 2, 32, 96>}, {pipeline_mode = #tpu.pipeline_mode<synchronous>, transform_indices = @transform_21, window_bounds = array<i64: 2, 1, 96>}, {pipeline_mode = #tpu.pipeline_mode<synchronous>, transform_indices = @transform_22, window_bounds = array<i64: 2, 32, 32>}, {pipeline_mode = #tpu.pipeline_mode<synchronous>, transform_indices = @transform_23, window_bounds = array<i64: 2, 1, 32>}, {pipeline_mode = #tpu.pipeline_mode<synchronous>, transform_indices = @transform_24, window_bounds = array<i64: 2, 32, 128>}, {pipeline_mode = #tpu.pipeline_mode<synchronous>, transform_indices = @transform_25, window_bounds = array<i64: 2, 1, 128>}, {pipeline_mode = #tpu.pipeline_mode<synchronous>, transform_indices = @transform_26, window_bounds = array<i64: 2, 128, 32>}, {pipeline_mode = #tpu.pipeline_mode<synchronous>, transform_indices = @transform_27, window_bounds = array<i64: 2, 1, 32>}, {pipeline_mode = #tpu.pipeline_mode<synchronous>, transform_indices = @transform_28, window_bounds = array<i64: 2, 1, 32>}, {pipeline_mode = #tpu.pipeline_mode<synchronous>, transform_indices = @transform_29, window_bounds = array<i64: 2, 1, 32>}, {pipeline_mode = #tpu.pipeline_mode<synchronous>, transform_indices = @transform_30, window_bounds = array<i64: 2, 1, 32>}, {pipeline_mode = #tpu.pipeline_mode<synchronous>, transform_indices = @transform_31, window_bounds = array<i64: 2, 1, 32>}, {pipeline_mode = #tpu.pipeline_mode<synchronous>, transform_indices = @transform_32, window_bounds = array<i64: 2, 32, 96>}, {pipeline_mode = #tpu.pipeline_mode<synchronous>, transform_indices = @transform_33, window_bounds = array<i64: 2, 1, 96>}, {pipeline_mode = #tpu.pipeline_mode<synchronous>, transform_indices = @transform_34, window_bounds = array<i64: 2, 32, 32>}, {pipeline_mode = #tpu.pipeline_mode<synchronous>, transform_indices = @transform_35, window_bounds = array<i64: 2, 1, 32>}, {pipeline_mode = #tpu.pipeline_mode<synchronous>, transform_indices = @transform_36, window_bounds = array<i64: 2, 32, 64>}, {pipeline_mode = #tpu.pipeline_mode<synchronous>, transform_indices = @transform_37, window_bounds = array<i64: 2, 1, 64>}, {pipeline_mode = #tpu.pipeline_mode<synchronous>, transform_indices = @transform_38, window_bounds = array<i64: 2, 64, 32>}, {pipeline_mode = #tpu.pipeline_mode<synchronous>, transform_indices = @transform_39, window_bounds = array<i64: 2, 1, 32>}, {pipeline_mode = #tpu.pipeline_mode<synchronous>, transform_indices = @transform_40, window_bounds = array<i64: 2, 1, 32>}, {pipeline_mode = #tpu.pipeline_mode<synchronous>, transform_indices = @transform_41, window_bounds = array<i64: 2, 1, 32>}, {pipeline_mode = #tpu.pipeline_mode<synchronous>, transform_indices = @transform_42, window_bounds = array<i64: 2, 1, 32>}, {pipeline_mode = #tpu.pipeline_mode<synchronous>, transform_indices = @transform_43, window_bounds = array<i64: 2, 1, 32>}, {pipeline_mode = #tpu.pipeline_mode<synchronous>, transform_indices = @transform_44, window_bounds = array<i64: 16, 8>}]} {
    %0 = tpu.iota {dimensions = array<i32: 1>} : vector<1x32xi32>
    %c0_i32 = arith.constant 0 : i32
    %1 = vector.broadcast %c0_i32 : i32 to vector<1x32xi32>
    %2 = arith.cmpi sge, %0, %1 : vector<1x32xi32>
    %c8_i32 = arith.constant 8 : i32
    %3 = vector.broadcast %c8_i32 : i32 to vector<1x32xi32>
    %4 = arith.cmpi slt, %0, %3 : vector<1x32xi32>
    %5 = arith.andi %2, %4 : vector<1x32xi1>
    %6 = arith.extui %5 : vector<1x32xi1> to vector<1x32xi32>
    %7 = arith.sitofp %6 : vector<1x32xi32> to vector<1x32xf32>
    %c8_i32_0 = arith.constant 8 : i32
    %8 = vector.broadcast %c8_i32_0 : i32 to vector<1x32xi32>
    %9 = arith.cmpi sge, %0, %8 : vector<1x32xi32>
    %c16_i32 = arith.constant 16 : i32
    %10 = vector.broadcast %c16_i32 : i32 to vector<1x32xi32>
    %11 = arith.cmpi slt, %0, %10 : vector<1x32xi32>
    %12 = arith.andi %9, %11 : vector<1x32xi1>
    %13 = arith.extui %12 : vector<1x32xi1> to vector<1x32xi32>
    %14 = arith.sitofp %13 : vector<1x32xi32> to vector<1x32xf32>
    %c16_i32_1 = arith.constant 16 : i32
    %15 = vector.broadcast %c16_i32_1 : i32 to vector<1x32xi32>
    %16 = arith.cmpi sge, %0, %15 : vector<1x32xi32>
    %c24_i32 = arith.constant 24 : i32
    %17 = vector.broadcast %c24_i32 : i32 to vector<1x32xi32>
    %18 = arith.cmpi slt, %0, %17 : vector<1x32xi32>
    %19 = arith.andi %16, %18 : vector<1x32xi1>
    %20 = arith.extui %19 : vector<1x32xi1> to vector<1x32xi32>
    %21 = arith.sitofp %20 : vector<1x32xi32> to vector<1x32xf32>
    %c24_i32_2 = arith.constant 24 : i32
    %22 = vector.broadcast %c24_i32_2 : i32 to vector<1x32xi32>
    %23 = arith.cmpi sge, %0, %22 : vector<1x32xi32>
    %c32_i32 = arith.constant 32 : i32
    %24 = vector.broadcast %c32_i32 : i32 to vector<1x32xi32>
    %25 = arith.cmpi slt, %0, %24 : vector<1x32xi32>
    %26 = arith.andi %23, %25 : vector<1x32xi1>
    %27 = arith.extui %26 : vector<1x32xi1> to vector<1x32xi32>
    %28 = arith.sitofp %27 : vector<1x32xi32> to vector<1x32xf32>
    %c0 = arith.constant 0 : index
    %c0_3 = arith.constant 0 : index
    %29 = vector.load %arg1[%c0, %c0_3] : memref<16x8xf32, #tpu.memory_space<vmem>>, vector<16x8xf32>
    %c0_4 = arith.constant 0 : index
    %c0_5 = arith.constant 0 : index
    %30 = vector.load %arg11[%c0_4, %c0_5] : memref<8x32xf32, #tpu.memory_space<vmem>>, vector<8x32xf32>
    %c0_6 = arith.constant 0 : index
    %c0_7 = arith.constant 0 : index
    %31 = vector.load %arg12[%c0_6, %c0_7] : memref<1x32xf32, #tpu.memory_space<vmem>>, vector<1x32xf32>
    %cst = arith.constant dense<0.000000e+00> : vector<16x32xf32>
    %32 = tpu.matmul %29, %30, %cst {dimension_numbers = #tpu.dot_dimension_numbers<[1], [0], [0], [1], [0, 0, 1, 1], [], []>} : vector<16x8xf32>, vector<8x32xf32>, vector<16x32xf32> -> vector<16x32xf32>
    %33 = vector.broadcast %31 : vector<1x32xf32> to vector<16x32xf32>
    %34 = arith.addf %32, %33 : vector<16x32xf32>
    %c0_8 = arith.constant 0 : index
    %c0_9 = arith.constant 0 : index
    %35 = vector.load %arg2[%c0_8, %c0_9] : memref<12x8xf32, #tpu.memory_space<vmem>>, vector<12x8xf32>
    %c0_10 = arith.constant 0 : index
    %c0_11 = arith.constant 0 : index
    %36 = vector.load %arg13[%c0_10, %c0_11] : memref<8x32xf32, #tpu.memory_space<vmem>>, vector<8x32xf32>
    %c0_12 = arith.constant 0 : index
    %c0_13 = arith.constant 0 : index
    %37 = vector.load %arg14[%c0_12, %c0_13] : memref<1x32xf32, #tpu.memory_space<vmem>>, vector<1x32xf32>
    %cst_14 = arith.constant dense<0.000000e+00> : vector<12x32xf32>
    %38 = tpu.matmul %35, %36, %cst_14 {dimension_numbers = #tpu.dot_dimension_numbers<[1], [0], [0], [1], [0, 0, 1, 1], [], []>} : vector<12x8xf32>, vector<8x32xf32>, vector<12x32xf32> -> vector<12x32xf32>
    %39 = vector.broadcast %37 : vector<1x32xf32> to vector<12x32xf32>
    %40 = arith.addf %38, %39 : vector<12x32xf32>
    %c0_15 = arith.constant 0 : index
    %c0_16 = arith.constant 0 : index
    %41 = vector.load %arg5[%c0_15, %c0_16] : memref<12x12xf32, #tpu.memory_space<vmem>>, vector<12x12xf32>
    %c0_17 = arith.constant 0 : index
    %c0_18 = arith.constant 0 : index
    %c0_19 = arith.constant 0 : index
    %42 = vector.load %arg21[%c0_17, %c0_18, %c0_19] : memref<2x32x96xf32, #tpu.memory_space<vmem>>, vector<1x32x96xf32>
    %43 = vector.shape_cast %42 : vector<1x32x96xf32> to vector<32x96xf32>
    %c0_20 = arith.constant 0 : index
    %c0_21 = arith.constant 0 : index
    %c0_22 = arith.constant 0 : index
    %44 = vector.load %arg22[%c0_20, %c0_21, %c0_22] : memref<2x1x96xf32, #tpu.memory_space<vmem>>, vector<1x1x96xf32>
    %45 = vector.shape_cast %44 : vector<1x1x96xf32> to vector<1x96xf32>
    %c0_23 = arith.constant 0 : index
    %c0_24 = arith.constant 0 : index
    %c0_25 = arith.constant 0 : index
    %46 = vector.load %arg23[%c0_23, %c0_24, %c0_25] : memref<2x32x32xf32, #tpu.memory_space<vmem>>, vector<1x32x32xf32>
    %47 = vector.shape_cast %46 : vector<1x32x32xf32> to vector<32x32xf32>
    %c0_26 = arith.constant 0 : index
    %c0_27 = arith.constant 0 : index
    %c0_28 = arith.constant 0 : index
    %48 = vector.load %arg24[%c0_26, %c0_27, %c0_28] : memref<2x1x32xf32, #tpu.memory_space<vmem>>, vector<1x1x32xf32>
    %49 = vector.shape_cast %48 : vector<1x1x32xf32> to vector<1x32xf32>
    %c0_29 = arith.constant 0 : index
    %c0_30 = arith.constant 0 : index
    %c0_31 = arith.constant 0 : index
    %50 = vector.load %arg25[%c0_29, %c0_30, %c0_31] : memref<2x32x128xf32, #tpu.memory_space<vmem>>, vector<1x32x128xf32>
    %51 = vector.shape_cast %50 : vector<1x32x128xf32> to vector<32x128xf32>
    %c0_32 = arith.constant 0 : index
    %c0_33 = arith.constant 0 : index
    %c0_34 = arith.constant 0 : index
    %52 = vector.load %arg26[%c0_32, %c0_33, %c0_34] : memref<2x1x128xf32, #tpu.memory_space<vmem>>, vector<1x1x128xf32>
    %53 = vector.shape_cast %52 : vector<1x1x128xf32> to vector<1x128xf32>
    %c0_35 = arith.constant 0 : index
    %c0_36 = arith.constant 0 : index
    %c0_37 = arith.constant 0 : index
    %54 = vector.load %arg27[%c0_35, %c0_36, %c0_37] : memref<2x128x32xf32, #tpu.memory_space<vmem>>, vector<1x128x32xf32>
    %55 = vector.shape_cast %54 : vector<1x128x32xf32> to vector<128x32xf32>
    %c0_38 = arith.constant 0 : index
    %c0_39 = arith.constant 0 : index
    %c0_40 = arith.constant 0 : index
    %56 = vector.load %arg28[%c0_38, %c0_39, %c0_40] : memref<2x1x32xf32, #tpu.memory_space<vmem>>, vector<1x1x32xf32>
    %57 = vector.shape_cast %56 : vector<1x1x32xf32> to vector<1x32xf32>
    %c0_41 = arith.constant 0 : index
    %c0_42 = arith.constant 0 : index
    %c0_43 = arith.constant 0 : index
    %58 = vector.load %arg29[%c0_41, %c0_42, %c0_43] : memref<2x1x32xf32, #tpu.memory_space<vmem>>, vector<1x1x32xf32>
    %59 = vector.shape_cast %58 : vector<1x1x32xf32> to vector<1x32xf32>
    %c0_44 = arith.constant 0 : index
    %c0_45 = arith.constant 0 : index
    %c0_46 = arith.constant 0 : index
    %60 = vector.load %arg30[%c0_44, %c0_45, %c0_46] : memref<2x1x32xf32, #tpu.memory_space<vmem>>, vector<1x1x32xf32>
    %61 = vector.shape_cast %60 : vector<1x1x32xf32> to vector<1x32xf32>
    %c0_47 = arith.constant 0 : index
    %c0_48 = arith.constant 0 : index
    %c0_49 = arith.constant 0 : index
    %62 = vector.load %arg31[%c0_47, %c0_48, %c0_49] : memref<2x1x32xf32, #tpu.memory_space<vmem>>, vector<1x1x32xf32>
    %63 = vector.shape_cast %62 : vector<1x1x32xf32> to vector<1x32xf32>
    %c0_50 = arith.constant 0 : index
    %c0_51 = arith.constant 0 : index
    %c0_52 = arith.constant 0 : index
    %64 = vector.load %arg32[%c0_50, %c0_51, %c0_52] : memref<2x1x32xf32, #tpu.memory_space<vmem>>, vector<1x1x32xf32>
    %65 = vector.shape_cast %64 : vector<1x1x32xf32> to vector<1x32xf32>
    %cst_53 = arith.constant dense<0.000000e+00> : vector<12x96xf32>
    %66 = tpu.matmul %40, %43, %cst_53 {dimension_numbers = #tpu.dot_dimension_numbers<[1], [0], [0], [1], [0, 0, 1, 1], [], []>} : vector<12x32xf32>, vector<32x96xf32>, vector<12x96xf32> -> vector<12x96xf32>
    %67 = vector.broadcast %45 : vector<1x96xf32> to vector<12x96xf32>
    %68 = arith.addf %66, %67 : vector<12x96xf32>
    %69 = vector.extract_strided_slice %68 {offsets = [0, 0], sizes = [12, 32], strides = [1, 1]} : vector<12x96xf32> to vector<12x32xf32>
    %70 = vector.extract_strided_slice %68 {offsets = [0, 32], sizes = [12, 32], strides = [1, 1]} : vector<12x96xf32> to vector<12x32xf32>
    %71 = vector.extract_strided_slice %68 {offsets = [0, 64], sizes = [12, 32], strides = [1, 1]} : vector<12x96xf32> to vector<12x32xf32>
    %72 = vector.broadcast %7 : vector<1x32xf32> to vector<12x32xf32>
    %73 = arith.mulf %69, %72 : vector<12x32xf32>
    %cst_54 = arith.constant dense<0.000000e+00> : vector<12x12xf32>
    %74 = tpu.matmul %73, %70, %cst_54 {dimension_numbers = #tpu.dot_dimension_numbers<[1], [1], [0], [0], [0, 0, 1, 0], [], []>} : vector<12x32xf32>, vector<12x32xf32>, vector<12x12xf32> -> vector<12x12xf32>
    %cst_55 = arith.constant 0.353553385 : f32
    %75 = vector.broadcast %cst_55 : f32 to vector<12x12xf32>
    %76 = arith.mulf %74, %75 : vector<12x12xf32>
    %77 = arith.addf %76, %41 : vector<12x12xf32>
    %cst_56 = arith.constant dense<0xFF800000> : vector<12xf32>
    %78 = vector.multi_reduction <maximumf>, %77, %cst_56 [1] : vector<12x12xf32> to vector<12xf32>
    %79 = vector.shape_cast %78 : vector<12xf32> to vector<12x1xf32>
    %80 = vector.broadcast %79 : vector<12x1xf32> to vector<12x12xf32>
    %81 = arith.subf %77, %80 : vector<12x12xf32>
    %82 = math.exp %81 : vector<12x12xf32>
    %cst_57 = arith.constant dense<0.000000e+00> : vector<12xf32>
    %83 = vector.multi_reduction <add>, %82, %cst_57 [1] : vector<12x12xf32> to vector<12xf32>
    %84 = vector.shape_cast %83 : vector<12xf32> to vector<12x1xf32>
    %85 = tpu.reciprocal %84 {approx = true} : vector<12x1xf32> -> vector<12x1xf32>
    %86 = vector.broadcast %85 : vector<12x1xf32> to vector<12x12xf32>
    %87 = arith.mulf %82, %86 : vector<12x12xf32>
    %88 = vector.broadcast %7 : vector<1x32xf32> to vector<12x32xf32>
    %89 = arith.mulf %71, %88 : vector<12x32xf32>
    %cst_58 = arith.constant dense<0.000000e+00> : vector<12x32xf32>
    %90 = tpu.matmul %87, %89, %cst_58 {dimension_numbers = #tpu.dot_dimension_numbers<[1], [0], [0], [1], [0, 0, 1, 1], [], []>} : vector<12x12xf32>, vector<12x32xf32>, vector<12x32xf32> -> vector<12x32xf32>
    %91 = vector.broadcast %14 : vector<1x32xf32> to vector<12x32xf32>
    %92 = arith.mulf %69, %91 : vector<12x32xf32>
    %cst_59 = arith.constant dense<0.000000e+00> : vector<12x12xf32>
    %93 = tpu.matmul %92, %70, %cst_59 {dimension_numbers = #tpu.dot_dimension_numbers<[1], [1], [0], [0], [0, 0, 1, 0], [], []>} : vector<12x32xf32>, vector<12x32xf32>, vector<12x12xf32> -> vector<12x12xf32>
    %cst_60 = arith.constant 0.353553385 : f32
    %94 = vector.broadcast %cst_60 : f32 to vector<12x12xf32>
    %95 = arith.mulf %93, %94 : vector<12x12xf32>
    %96 = arith.addf %95, %41 : vector<12x12xf32>
    %cst_61 = arith.constant dense<0xFF800000> : vector<12xf32>
    %97 = vector.multi_reduction <maximumf>, %96, %cst_61 [1] : vector<12x12xf32> to vector<12xf32>
    %98 = vector.shape_cast %97 : vector<12xf32> to vector<12x1xf32>
    %99 = vector.broadcast %98 : vector<12x1xf32> to vector<12x12xf32>
    %100 = arith.subf %96, %99 : vector<12x12xf32>
    %101 = math.exp %100 : vector<12x12xf32>
    %cst_62 = arith.constant dense<0.000000e+00> : vector<12xf32>
    %102 = vector.multi_reduction <add>, %101, %cst_62 [1] : vector<12x12xf32> to vector<12xf32>
    %103 = vector.shape_cast %102 : vector<12xf32> to vector<12x1xf32>
    %104 = tpu.reciprocal %103 {approx = true} : vector<12x1xf32> -> vector<12x1xf32>
    %105 = vector.broadcast %104 : vector<12x1xf32> to vector<12x12xf32>
    %106 = arith.mulf %101, %105 : vector<12x12xf32>
    %107 = vector.broadcast %14 : vector<1x32xf32> to vector<12x32xf32>
    %108 = arith.mulf %71, %107 : vector<12x32xf32>
    %cst_63 = arith.constant dense<0.000000e+00> : vector<12x32xf32>
    %109 = tpu.matmul %106, %108, %cst_63 {dimension_numbers = #tpu.dot_dimension_numbers<[1], [0], [0], [1], [0, 0, 1, 1], [], []>} : vector<12x12xf32>, vector<12x32xf32>, vector<12x32xf32> -> vector<12x32xf32>
    %110 = arith.addf %90, %109 : vector<12x32xf32>
    %111 = vector.broadcast %21 : vector<1x32xf32> to vector<12x32xf32>
    %112 = arith.mulf %69, %111 : vector<12x32xf32>
    %cst_64 = arith.constant dense<0.000000e+00> : vector<12x12xf32>
    %113 = tpu.matmul %112, %70, %cst_64 {dimension_numbers = #tpu.dot_dimension_numbers<[1], [1], [0], [0], [0, 0, 1, 0], [], []>} : vector<12x32xf32>, vector<12x32xf32>, vector<12x12xf32> -> vector<12x12xf32>
    %cst_65 = arith.constant 0.353553385 : f32
    %114 = vector.broadcast %cst_65 : f32 to vector<12x12xf32>
    %115 = arith.mulf %113, %114 : vector<12x12xf32>
    %116 = arith.addf %115, %41 : vector<12x12xf32>
    %cst_66 = arith.constant dense<0xFF800000> : vector<12xf32>
    %117 = vector.multi_reduction <maximumf>, %116, %cst_66 [1] : vector<12x12xf32> to vector<12xf32>
    %118 = vector.shape_cast %117 : vector<12xf32> to vector<12x1xf32>
    %119 = vector.broadcast %118 : vector<12x1xf32> to vector<12x12xf32>
    %120 = arith.subf %116, %119 : vector<12x12xf32>
    %121 = math.exp %120 : vector<12x12xf32>
    %cst_67 = arith.constant dense<0.000000e+00> : vector<12xf32>
    %122 = vector.multi_reduction <add>, %121, %cst_67 [1] : vector<12x12xf32> to vector<12xf32>
    %123 = vector.shape_cast %122 : vector<12xf32> to vector<12x1xf32>
    %124 = tpu.reciprocal %123 {approx = true} : vector<12x1xf32> -> vector<12x1xf32>
    %125 = vector.broadcast %124 : vector<12x1xf32> to vector<12x12xf32>
    %126 = arith.mulf %121, %125 : vector<12x12xf32>
    %127 = vector.broadcast %21 : vector<1x32xf32> to vector<12x32xf32>
    %128 = arith.mulf %71, %127 : vector<12x32xf32>
    %cst_68 = arith.constant dense<0.000000e+00> : vector<12x32xf32>
    %129 = tpu.matmul %126, %128, %cst_68 {dimension_numbers = #tpu.dot_dimension_numbers<[1], [0], [0], [1], [0, 0, 1, 1], [], []>} : vector<12x12xf32>, vector<12x32xf32>, vector<12x32xf32> -> vector<12x32xf32>
    %130 = arith.addf %110, %129 : vector<12x32xf32>
    %131 = vector.broadcast %28 : vector<1x32xf32> to vector<12x32xf32>
    %132 = arith.mulf %69, %131 : vector<12x32xf32>
    %cst_69 = arith.constant dense<0.000000e+00> : vector<12x12xf32>
    %133 = tpu.matmul %132, %70, %cst_69 {dimension_numbers = #tpu.dot_dimension_numbers<[1], [1], [0], [0], [0, 0, 1, 0], [], []>} : vector<12x32xf32>, vector<12x32xf32>, vector<12x12xf32> -> vector<12x12xf32>
    %cst_70 = arith.constant 0.353553385 : f32
    %134 = vector.broadcast %cst_70 : f32 to vector<12x12xf32>
    %135 = arith.mulf %133, %134 : vector<12x12xf32>
    %136 = arith.addf %135, %41 : vector<12x12xf32>
    %cst_71 = arith.constant dense<0xFF800000> : vector<12xf32>
    %137 = vector.multi_reduction <maximumf>, %136, %cst_71 [1] : vector<12x12xf32> to vector<12xf32>
    %138 = vector.shape_cast %137 : vector<12xf32> to vector<12x1xf32>
    %139 = vector.broadcast %138 : vector<12x1xf32> to vector<12x12xf32>
    %140 = arith.subf %136, %139 : vector<12x12xf32>
    %141 = math.exp %140 : vector<12x12xf32>
    %cst_72 = arith.constant dense<0.000000e+00> : vector<12xf32>
    %142 = vector.multi_reduction <add>, %141, %cst_72 [1] : vector<12x12xf32> to vector<12xf32>
    %143 = vector.shape_cast %142 : vector<12xf32> to vector<12x1xf32>
    %144 = tpu.reciprocal %143 {approx = true} : vector<12x1xf32> -> vector<12x1xf32>
    %145 = vector.broadcast %144 : vector<12x1xf32> to vector<12x12xf32>
    %146 = arith.mulf %141, %145 : vector<12x12xf32>
    %147 = vector.broadcast %28 : vector<1x32xf32> to vector<12x32xf32>
    %148 = arith.mulf %71, %147 : vector<12x32xf32>
    %cst_73 = arith.constant dense<0.000000e+00> : vector<12x32xf32>
    %149 = tpu.matmul %146, %148, %cst_73 {dimension_numbers = #tpu.dot_dimension_numbers<[1], [0], [0], [1], [0, 0, 1, 1], [], []>} : vector<12x12xf32>, vector<12x32xf32>, vector<12x32xf32> -> vector<12x32xf32>
    %150 = arith.addf %130, %149 : vector<12x32xf32>
    %cst_74 = arith.constant dense<0.000000e+00> : vector<12x32xf32>
    %151 = tpu.matmul %150, %47, %cst_74 {dimension_numbers = #tpu.dot_dimension_numbers<[1], [0], [0], [1], [0, 0, 1, 1], [], []>} : vector<12x32xf32>, vector<32x32xf32>, vector<12x32xf32> -> vector<12x32xf32>
    %152 = vector.broadcast %49 : vector<1x32xf32> to vector<12x32xf32>
    %153 = arith.addf %151, %152 : vector<12x32xf32>
    %154 = arith.addf %40, %153 : vector<12x32xf32>
    %cst_75 = arith.constant dense<0.000000e+00> : vector<12xf32>
    %155 = vector.multi_reduction <add>, %154, %cst_75 [1] : vector<12x32xf32> to vector<12xf32>
    %156 = vector.shape_cast %155 : vector<12xf32> to vector<12x1xf32>
    %cst_76 = arith.constant 3.200000e+01 : f32
    %157 = vector.broadcast %cst_76 : f32 to vector<12x1xf32>
    %158 = arith.divf %156, %157 : vector<12x1xf32>
    %159 = vector.broadcast %158 : vector<12x1xf32> to vector<12x32xf32>
    %160 = arith.subf %154, %159 : vector<12x32xf32>
    %161 = arith.mulf %160, %160 : vector<12x32xf32>
    %cst_77 = arith.constant dense<0.000000e+00> : vector<12xf32>
    %162 = vector.multi_reduction <add>, %161, %cst_77 [1] : vector<12x32xf32> to vector<12xf32>
    %163 = vector.shape_cast %162 : vector<12xf32> to vector<12x1xf32>
    %cst_78 = arith.constant 3.200000e+01 : f32
    %164 = vector.broadcast %cst_78 : f32 to vector<12x1xf32>
    %165 = arith.divf %163, %164 : vector<12x1xf32>
    %166 = vector.broadcast %158 : vector<12x1xf32> to vector<12x32xf32>
    %167 = arith.subf %154, %166 : vector<12x32xf32>
    %cst_79 = arith.constant 9.99999974E-6 : f32
    %168 = vector.broadcast %cst_79 : f32 to vector<12x1xf32>
    %169 = arith.addf %165, %168 : vector<12x1xf32>
    %170 = math.rsqrt %169 : vector<12x1xf32>
    %171 = vector.broadcast %170 : vector<12x1xf32> to vector<12x32xf32>
    %172 = arith.mulf %167, %171 : vector<12x32xf32>
    %173 = vector.broadcast %59 : vector<1x32xf32> to vector<12x32xf32>
    %174 = arith.mulf %172, %173 : vector<12x32xf32>
    %175 = vector.broadcast %61 : vector<1x32xf32> to vector<12x32xf32>
    %176 = arith.addf %174, %175 : vector<12x32xf32>
    %cst_80 = arith.constant dense<0.000000e+00> : vector<12x128xf32>
    %177 = tpu.matmul %176, %51, %cst_80 {dimension_numbers = #tpu.dot_dimension_numbers<[1], [0], [0], [1], [0, 0, 1, 1], [], []>} : vector<12x32xf32>, vector<32x128xf32>, vector<12x128xf32> -> vector<12x128xf32>
    %178 = vector.broadcast %53 : vector<1x128xf32> to vector<12x128xf32>
    %179 = arith.addf %177, %178 : vector<12x128xf32>
    %cst_81 = arith.constant 5.000000e-01 : f32
    %180 = vector.broadcast %cst_81 : f32 to vector<12x128xf32>
    %181 = arith.mulf %180, %179 : vector<12x128xf32>
    %cst_82 = arith.constant 0.707106769 : f32
    %182 = vector.broadcast %cst_82 : f32 to vector<12x128xf32>
    %183 = arith.mulf %179, %182 : vector<12x128xf32>
    %184 = math.erf %183 : vector<12x128xf32>
    %cst_83 = arith.constant 1.000000e+00 : f32
    %185 = vector.broadcast %cst_83 : f32 to vector<12x128xf32>
    %186 = arith.addf %185, %184 : vector<12x128xf32>
    %187 = arith.mulf %181, %186 : vector<12x128xf32>
    %cst_84 = arith.constant dense<0.000000e+00> : vector<12x32xf32>
    %188 = tpu.matmul %187, %55, %cst_84 {dimension_numbers = #tpu.dot_dimension_numbers<[1], [0], [0], [1], [0, 0, 1, 1], [], []>} : vector<12x128xf32>, vector<128x32xf32>, vector<12x32xf32> -> vector<12x32xf32>
    %189 = vector.broadcast %57 : vector<1x32xf32> to vector<12x32xf32>
    %190 = arith.addf %188, %189 : vector<12x32xf32>
    %191 = arith.addf %176, %190 : vector<12x32xf32>
    %cst_85 = arith.constant dense<0.000000e+00> : vector<12xf32>
    %192 = vector.multi_reduction <add>, %191, %cst_85 [1] : vector<12x32xf32> to vector<12xf32>
    %193 = vector.shape_cast %192 : vector<12xf32> to vector<12x1xf32>
    %cst_86 = arith.constant 3.200000e+01 : f32
    %194 = vector.broadcast %cst_86 : f32 to vector<12x1xf32>
    %195 = arith.divf %193, %194 : vector<12x1xf32>
    %196 = vector.broadcast %195 : vector<12x1xf32> to vector<12x32xf32>
    %197 = arith.subf %191, %196 : vector<12x32xf32>
    %198 = arith.mulf %197, %197 : vector<12x32xf32>
    %cst_87 = arith.constant dense<0.000000e+00> : vector<12xf32>
    %199 = vector.multi_reduction <add>, %198, %cst_87 [1] : vector<12x32xf32> to vector<12xf32>
    %200 = vector.shape_cast %199 : vector<12xf32> to vector<12x1xf32>
    %cst_88 = arith.constant 3.200000e+01 : f32
    %201 = vector.broadcast %cst_88 : f32 to vector<12x1xf32>
    %202 = arith.divf %200, %201 : vector<12x1xf32>
    %203 = vector.broadcast %195 : vector<12x1xf32> to vector<12x32xf32>
    %204 = arith.subf %191, %203 : vector<12x32xf32>
    %cst_89 = arith.constant 9.99999974E-6 : f32
    %205 = vector.broadcast %cst_89 : f32 to vector<12x1xf32>
    %206 = arith.addf %202, %205 : vector<12x1xf32>
    %207 = math.rsqrt %206 : vector<12x1xf32>
    %208 = vector.broadcast %207 : vector<12x1xf32> to vector<12x32xf32>
    %209 = arith.mulf %204, %208 : vector<12x32xf32>
    %210 = vector.broadcast %63 : vector<1x32xf32> to vector<12x32xf32>
    %211 = arith.mulf %209, %210 : vector<12x32xf32>
    %212 = vector.broadcast %65 : vector<1x32xf32> to vector<12x32xf32>
    %213 = arith.addf %211, %212 : vector<12x32xf32>
    %c1 = arith.constant 1 : index
    %c0_90 = arith.constant 0 : index
    %c0_91 = arith.constant 0 : index
    %214 = vector.load %arg21[%c1, %c0_90, %c0_91] : memref<2x32x96xf32, #tpu.memory_space<vmem>>, vector<1x32x96xf32>
    %215 = vector.shape_cast %214 : vector<1x32x96xf32> to vector<32x96xf32>
    %c1_92 = arith.constant 1 : index
    %c0_93 = arith.constant 0 : index
    %c0_94 = arith.constant 0 : index
    %216 = vector.load %arg22[%c1_92, %c0_93, %c0_94] : memref<2x1x96xf32, #tpu.memory_space<vmem>>, vector<1x1x96xf32>
    %217 = vector.shape_cast %216 : vector<1x1x96xf32> to vector<1x96xf32>
    %c1_95 = arith.constant 1 : index
    %c0_96 = arith.constant 0 : index
    %c0_97 = arith.constant 0 : index
    %218 = vector.load %arg23[%c1_95, %c0_96, %c0_97] : memref<2x32x32xf32, #tpu.memory_space<vmem>>, vector<1x32x32xf32>
    %219 = vector.shape_cast %218 : vector<1x32x32xf32> to vector<32x32xf32>
    %c1_98 = arith.constant 1 : index
    %c0_99 = arith.constant 0 : index
    %c0_100 = arith.constant 0 : index
    %220 = vector.load %arg24[%c1_98, %c0_99, %c0_100] : memref<2x1x32xf32, #tpu.memory_space<vmem>>, vector<1x1x32xf32>
    %221 = vector.shape_cast %220 : vector<1x1x32xf32> to vector<1x32xf32>
    %c1_101 = arith.constant 1 : index
    %c0_102 = arith.constant 0 : index
    %c0_103 = arith.constant 0 : index
    %222 = vector.load %arg25[%c1_101, %c0_102, %c0_103] : memref<2x32x128xf32, #tpu.memory_space<vmem>>, vector<1x32x128xf32>
    %223 = vector.shape_cast %222 : vector<1x32x128xf32> to vector<32x128xf32>
    %c1_104 = arith.constant 1 : index
    %c0_105 = arith.constant 0 : index
    %c0_106 = arith.constant 0 : index
    %224 = vector.load %arg26[%c1_104, %c0_105, %c0_106] : memref<2x1x128xf32, #tpu.memory_space<vmem>>, vector<1x1x128xf32>
    %225 = vector.shape_cast %224 : vector<1x1x128xf32> to vector<1x128xf32>
    %c1_107 = arith.constant 1 : index
    %c0_108 = arith.constant 0 : index
    %c0_109 = arith.constant 0 : index
    %226 = vector.load %arg27[%c1_107, %c0_108, %c0_109] : memref<2x128x32xf32, #tpu.memory_space<vmem>>, vector<1x128x32xf32>
    %227 = vector.shape_cast %226 : vector<1x128x32xf32> to vector<128x32xf32>
    %c1_110 = arith.constant 1 : index
    %c0_111 = arith.constant 0 : index
    %c0_112 = arith.constant 0 : index
    %228 = vector.load %arg28[%c1_110, %c0_111, %c0_112] : memref<2x1x32xf32, #tpu.memory_space<vmem>>, vector<1x1x32xf32>
    %229 = vector.shape_cast %228 : vector<1x1x32xf32> to vector<1x32xf32>
    %c1_113 = arith.constant 1 : index
    %c0_114 = arith.constant 0 : index
    %c0_115 = arith.constant 0 : index
    %230 = vector.load %arg29[%c1_113, %c0_114, %c0_115] : memref<2x1x32xf32, #tpu.memory_space<vmem>>, vector<1x1x32xf32>
    %231 = vector.shape_cast %230 : vector<1x1x32xf32> to vector<1x32xf32>
    %c1_116 = arith.constant 1 : index
    %c0_117 = arith.constant 0 : index
    %c0_118 = arith.constant 0 : index
    %232 = vector.load %arg30[%c1_116, %c0_117, %c0_118] : memref<2x1x32xf32, #tpu.memory_space<vmem>>, vector<1x1x32xf32>
    %233 = vector.shape_cast %232 : vector<1x1x32xf32> to vector<1x32xf32>
    %c1_119 = arith.constant 1 : index
    %c0_120 = arith.constant 0 : index
    %c0_121 = arith.constant 0 : index
    %234 = vector.load %arg31[%c1_119, %c0_120, %c0_121] : memref<2x1x32xf32, #tpu.memory_space<vmem>>, vector<1x1x32xf32>
    %235 = vector.shape_cast %234 : vector<1x1x32xf32> to vector<1x32xf32>
    %c1_122 = arith.constant 1 : index
    %c0_123 = arith.constant 0 : index
    %c0_124 = arith.constant 0 : index
    %236 = vector.load %arg32[%c1_122, %c0_123, %c0_124] : memref<2x1x32xf32, #tpu.memory_space<vmem>>, vector<1x1x32xf32>
    %237 = vector.shape_cast %236 : vector<1x1x32xf32> to vector<1x32xf32>
    %cst_125 = arith.constant dense<0.000000e+00> : vector<12x96xf32>
    %238 = tpu.matmul %213, %215, %cst_125 {dimension_numbers = #tpu.dot_dimension_numbers<[1], [0], [0], [1], [0, 0, 1, 1], [], []>} : vector<12x32xf32>, vector<32x96xf32>, vector<12x96xf32> -> vector<12x96xf32>
    %239 = vector.broadcast %217 : vector<1x96xf32> to vector<12x96xf32>
    %240 = arith.addf %238, %239 : vector<12x96xf32>
    %241 = vector.extract_strided_slice %240 {offsets = [0, 0], sizes = [12, 32], strides = [1, 1]} : vector<12x96xf32> to vector<12x32xf32>
    %242 = vector.extract_strided_slice %240 {offsets = [0, 32], sizes = [12, 32], strides = [1, 1]} : vector<12x96xf32> to vector<12x32xf32>
    %243 = vector.extract_strided_slice %240 {offsets = [0, 64], sizes = [12, 32], strides = [1, 1]} : vector<12x96xf32> to vector<12x32xf32>
    %244 = vector.broadcast %7 : vector<1x32xf32> to vector<12x32xf32>
    %245 = arith.mulf %241, %244 : vector<12x32xf32>
    %cst_126 = arith.constant dense<0.000000e+00> : vector<12x12xf32>
    %246 = tpu.matmul %245, %242, %cst_126 {dimension_numbers = #tpu.dot_dimension_numbers<[1], [1], [0], [0], [0, 0, 1, 0], [], []>} : vector<12x32xf32>, vector<12x32xf32>, vector<12x12xf32> -> vector<12x12xf32>
    %cst_127 = arith.constant 0.353553385 : f32
    %247 = vector.broadcast %cst_127 : f32 to vector<12x12xf32>
    %248 = arith.mulf %246, %247 : vector<12x12xf32>
    %249 = arith.addf %248, %41 : vector<12x12xf32>
    %cst_128 = arith.constant dense<0xFF800000> : vector<12xf32>
    %250 = vector.multi_reduction <maximumf>, %249, %cst_128 [1] : vector<12x12xf32> to vector<12xf32>
    %251 = vector.shape_cast %250 : vector<12xf32> to vector<12x1xf32>
    %252 = vector.broadcast %251 : vector<12x1xf32> to vector<12x12xf32>
    %253 = arith.subf %249, %252 : vector<12x12xf32>
    %254 = math.exp %253 : vector<12x12xf32>
    %cst_129 = arith.constant dense<0.000000e+00> : vector<12xf32>
    %255 = vector.multi_reduction <add>, %254, %cst_129 [1] : vector<12x12xf32> to vector<12xf32>
    %256 = vector.shape_cast %255 : vector<12xf32> to vector<12x1xf32>
    %257 = tpu.reciprocal %256 {approx = true} : vector<12x1xf32> -> vector<12x1xf32>
    %258 = vector.broadcast %257 : vector<12x1xf32> to vector<12x12xf32>
    %259 = arith.mulf %254, %258 : vector<12x12xf32>
    %260 = vector.broadcast %7 : vector<1x32xf32> to vector<12x32xf32>
    %261 = arith.mulf %243, %260 : vector<12x32xf32>
    %cst_130 = arith.constant dense<0.000000e+00> : vector<12x32xf32>
    %262 = tpu.matmul %259, %261, %cst_130 {dimension_numbers = #tpu.dot_dimension_numbers<[1], [0], [0], [1], [0, 0, 1, 1], [], []>} : vector<12x12xf32>, vector<12x32xf32>, vector<12x32xf32> -> vector<12x32xf32>
    %263 = vector.broadcast %14 : vector<1x32xf32> to vector<12x32xf32>
    %264 = arith.mulf %241, %263 : vector<12x32xf32>
    %cst_131 = arith.constant dense<0.000000e+00> : vector<12x12xf32>
    %265 = tpu.matmul %264, %242, %cst_131 {dimension_numbers = #tpu.dot_dimension_numbers<[1], [1], [0], [0], [0, 0, 1, 0], [], []>} : vector<12x32xf32>, vector<12x32xf32>, vector<12x12xf32> -> vector<12x12xf32>
    %cst_132 = arith.constant 0.353553385 : f32
    %266 = vector.broadcast %cst_132 : f32 to vector<12x12xf32>
    %267 = arith.mulf %265, %266 : vector<12x12xf32>
    %268 = arith.addf %267, %41 : vector<12x12xf32>
    %cst_133 = arith.constant dense<0xFF800000> : vector<12xf32>
    %269 = vector.multi_reduction <maximumf>, %268, %cst_133 [1] : vector<12x12xf32> to vector<12xf32>
    %270 = vector.shape_cast %269 : vector<12xf32> to vector<12x1xf32>
    %271 = vector.broadcast %270 : vector<12x1xf32> to vector<12x12xf32>
    %272 = arith.subf %268, %271 : vector<12x12xf32>
    %273 = math.exp %272 : vector<12x12xf32>
    %cst_134 = arith.constant dense<0.000000e+00> : vector<12xf32>
    %274 = vector.multi_reduction <add>, %273, %cst_134 [1] : vector<12x12xf32> to vector<12xf32>
    %275 = vector.shape_cast %274 : vector<12xf32> to vector<12x1xf32>
    %276 = tpu.reciprocal %275 {approx = true} : vector<12x1xf32> -> vector<12x1xf32>
    %277 = vector.broadcast %276 : vector<12x1xf32> to vector<12x12xf32>
    %278 = arith.mulf %273, %277 : vector<12x12xf32>
    %279 = vector.broadcast %14 : vector<1x32xf32> to vector<12x32xf32>
    %280 = arith.mulf %243, %279 : vector<12x32xf32>
    %cst_135 = arith.constant dense<0.000000e+00> : vector<12x32xf32>
    %281 = tpu.matmul %278, %280, %cst_135 {dimension_numbers = #tpu.dot_dimension_numbers<[1], [0], [0], [1], [0, 0, 1, 1], [], []>} : vector<12x12xf32>, vector<12x32xf32>, vector<12x32xf32> -> vector<12x32xf32>
    %282 = arith.addf %262, %281 : vector<12x32xf32>
    %283 = vector.broadcast %21 : vector<1x32xf32> to vector<12x32xf32>
    %284 = arith.mulf %241, %283 : vector<12x32xf32>
    %cst_136 = arith.constant dense<0.000000e+00> : vector<12x12xf32>
    %285 = tpu.matmul %284, %242, %cst_136 {dimension_numbers = #tpu.dot_dimension_numbers<[1], [1], [0], [0], [0, 0, 1, 0], [], []>} : vector<12x32xf32>, vector<12x32xf32>, vector<12x12xf32> -> vector<12x12xf32>
    %cst_137 = arith.constant 0.353553385 : f32
    %286 = vector.broadcast %cst_137 : f32 to vector<12x12xf32>
    %287 = arith.mulf %285, %286 : vector<12x12xf32>
    %288 = arith.addf %287, %41 : vector<12x12xf32>
    %cst_138 = arith.constant dense<0xFF800000> : vector<12xf32>
    %289 = vector.multi_reduction <maximumf>, %288, %cst_138 [1] : vector<12x12xf32> to vector<12xf32>
    %290 = vector.shape_cast %289 : vector<12xf32> to vector<12x1xf32>
    %291 = vector.broadcast %290 : vector<12x1xf32> to vector<12x12xf32>
    %292 = arith.subf %288, %291 : vector<12x12xf32>
    %293 = math.exp %292 : vector<12x12xf32>
    %cst_139 = arith.constant dense<0.000000e+00> : vector<12xf32>
    %294 = vector.multi_reduction <add>, %293, %cst_139 [1] : vector<12x12xf32> to vector<12xf32>
    %295 = vector.shape_cast %294 : vector<12xf32> to vector<12x1xf32>
    %296 = tpu.reciprocal %295 {approx = true} : vector<12x1xf32> -> vector<12x1xf32>
    %297 = vector.broadcast %296 : vector<12x1xf32> to vector<12x12xf32>
    %298 = arith.mulf %293, %297 : vector<12x12xf32>
    %299 = vector.broadcast %21 : vector<1x32xf32> to vector<12x32xf32>
    %300 = arith.mulf %243, %299 : vector<12x32xf32>
    %cst_140 = arith.constant dense<0.000000e+00> : vector<12x32xf32>
    %301 = tpu.matmul %298, %300, %cst_140 {dimension_numbers = #tpu.dot_dimension_numbers<[1], [0], [0], [1], [0, 0, 1, 1], [], []>} : vector<12x12xf32>, vector<12x32xf32>, vector<12x32xf32> -> vector<12x32xf32>
    %302 = arith.addf %282, %301 : vector<12x32xf32>
    %303 = vector.broadcast %28 : vector<1x32xf32> to vector<12x32xf32>
    %304 = arith.mulf %241, %303 : vector<12x32xf32>
    %cst_141 = arith.constant dense<0.000000e+00> : vector<12x12xf32>
    %305 = tpu.matmul %304, %242, %cst_141 {dimension_numbers = #tpu.dot_dimension_numbers<[1], [1], [0], [0], [0, 0, 1, 0], [], []>} : vector<12x32xf32>, vector<12x32xf32>, vector<12x12xf32> -> vector<12x12xf32>
    %cst_142 = arith.constant 0.353553385 : f32
    %306 = vector.broadcast %cst_142 : f32 to vector<12x12xf32>
    %307 = arith.mulf %305, %306 : vector<12x12xf32>
    %308 = arith.addf %307, %41 : vector<12x12xf32>
    %cst_143 = arith.constant dense<0xFF800000> : vector<12xf32>
    %309 = vector.multi_reduction <maximumf>, %308, %cst_143 [1] : vector<12x12xf32> to vector<12xf32>
    %310 = vector.shape_cast %309 : vector<12xf32> to vector<12x1xf32>
    %311 = vector.broadcast %310 : vector<12x1xf32> to vector<12x12xf32>
    %312 = arith.subf %308, %311 : vector<12x12xf32>
    %313 = math.exp %312 : vector<12x12xf32>
    %cst_144 = arith.constant dense<0.000000e+00> : vector<12xf32>
    %314 = vector.multi_reduction <add>, %313, %cst_144 [1] : vector<12x12xf32> to vector<12xf32>
    %315 = vector.shape_cast %314 : vector<12xf32> to vector<12x1xf32>
    %316 = tpu.reciprocal %315 {approx = true} : vector<12x1xf32> -> vector<12x1xf32>
    %317 = vector.broadcast %316 : vector<12x1xf32> to vector<12x12xf32>
    %318 = arith.mulf %313, %317 : vector<12x12xf32>
    %319 = vector.broadcast %28 : vector<1x32xf32> to vector<12x32xf32>
    %320 = arith.mulf %243, %319 : vector<12x32xf32>
    %cst_145 = arith.constant dense<0.000000e+00> : vector<12x32xf32>
    %321 = tpu.matmul %318, %320, %cst_145 {dimension_numbers = #tpu.dot_dimension_numbers<[1], [0], [0], [1], [0, 0, 1, 1], [], []>} : vector<12x12xf32>, vector<12x32xf32>, vector<12x32xf32> -> vector<12x32xf32>
    %322 = arith.addf %302, %321 : vector<12x32xf32>
    %cst_146 = arith.constant dense<0.000000e+00> : vector<12x32xf32>
    %323 = tpu.matmul %322, %219, %cst_146 {dimension_numbers = #tpu.dot_dimension_numbers<[1], [0], [0], [1], [0, 0, 1, 1], [], []>} : vector<12x32xf32>, vector<32x32xf32>, vector<12x32xf32> -> vector<12x32xf32>
    %324 = vector.broadcast %221 : vector<1x32xf32> to vector<12x32xf32>
    %325 = arith.addf %323, %324 : vector<12x32xf32>
    %326 = arith.addf %213, %325 : vector<12x32xf32>
    %cst_147 = arith.constant dense<0.000000e+00> : vector<12xf32>
    %327 = vector.multi_reduction <add>, %326, %cst_147 [1] : vector<12x32xf32> to vector<12xf32>
    %328 = vector.shape_cast %327 : vector<12xf32> to vector<12x1xf32>
    %cst_148 = arith.constant 3.200000e+01 : f32
    %329 = vector.broadcast %cst_148 : f32 to vector<12x1xf32>
    %330 = arith.divf %328, %329 : vector<12x1xf32>
    %331 = vector.broadcast %330 : vector<12x1xf32> to vector<12x32xf32>
    %332 = arith.subf %326, %331 : vector<12x32xf32>
    %333 = arith.mulf %332, %332 : vector<12x32xf32>
    %cst_149 = arith.constant dense<0.000000e+00> : vector<12xf32>
    %334 = vector.multi_reduction <add>, %333, %cst_149 [1] : vector<12x32xf32> to vector<12xf32>
    %335 = vector.shape_cast %334 : vector<12xf32> to vector<12x1xf32>
    %cst_150 = arith.constant 3.200000e+01 : f32
    %336 = vector.broadcast %cst_150 : f32 to vector<12x1xf32>
    %337 = arith.divf %335, %336 : vector<12x1xf32>
    %338 = vector.broadcast %330 : vector<12x1xf32> to vector<12x32xf32>
    %339 = arith.subf %326, %338 : vector<12x32xf32>
    %cst_151 = arith.constant 9.99999974E-6 : f32
    %340 = vector.broadcast %cst_151 : f32 to vector<12x1xf32>
    %341 = arith.addf %337, %340 : vector<12x1xf32>
    %342 = math.rsqrt %341 : vector<12x1xf32>
    %343 = vector.broadcast %342 : vector<12x1xf32> to vector<12x32xf32>
    %344 = arith.mulf %339, %343 : vector<12x32xf32>
    %345 = vector.broadcast %231 : vector<1x32xf32> to vector<12x32xf32>
    %346 = arith.mulf %344, %345 : vector<12x32xf32>
    %347 = vector.broadcast %233 : vector<1x32xf32> to vector<12x32xf32>
    %348 = arith.addf %346, %347 : vector<12x32xf32>
    %cst_152 = arith.constant dense<0.000000e+00> : vector<12x128xf32>
    %349 = tpu.matmul %348, %223, %cst_152 {dimension_numbers = #tpu.dot_dimension_numbers<[1], [0], [0], [1], [0, 0, 1, 1], [], []>} : vector<12x32xf32>, vector<32x128xf32>, vector<12x128xf32> -> vector<12x128xf32>
    %350 = vector.broadcast %225 : vector<1x128xf32> to vector<12x128xf32>
    %351 = arith.addf %349, %350 : vector<12x128xf32>
    %cst_153 = arith.constant 5.000000e-01 : f32
    %352 = vector.broadcast %cst_153 : f32 to vector<12x128xf32>
    %353 = arith.mulf %352, %351 : vector<12x128xf32>
    %cst_154 = arith.constant 0.707106769 : f32
    %354 = vector.broadcast %cst_154 : f32 to vector<12x128xf32>
    %355 = arith.mulf %351, %354 : vector<12x128xf32>
    %356 = math.erf %355 : vector<12x128xf32>
    %cst_155 = arith.constant 1.000000e+00 : f32
    %357 = vector.broadcast %cst_155 : f32 to vector<12x128xf32>
    %358 = arith.addf %357, %356 : vector<12x128xf32>
    %359 = arith.mulf %353, %358 : vector<12x128xf32>
    %cst_156 = arith.constant dense<0.000000e+00> : vector<12x32xf32>
    %360 = tpu.matmul %359, %227, %cst_156 {dimension_numbers = #tpu.dot_dimension_numbers<[1], [0], [0], [1], [0, 0, 1, 1], [], []>} : vector<12x128xf32>, vector<128x32xf32>, vector<12x32xf32> -> vector<12x32xf32>
    %361 = vector.broadcast %229 : vector<1x32xf32> to vector<12x32xf32>
    %362 = arith.addf %360, %361 : vector<12x32xf32>
    %363 = arith.addf %348, %362 : vector<12x32xf32>
    %cst_157 = arith.constant dense<0.000000e+00> : vector<12xf32>
    %364 = vector.multi_reduction <add>, %363, %cst_157 [1] : vector<12x32xf32> to vector<12xf32>
    %365 = vector.shape_cast %364 : vector<12xf32> to vector<12x1xf32>
    %cst_158 = arith.constant 3.200000e+01 : f32
    %366 = vector.broadcast %cst_158 : f32 to vector<12x1xf32>
    %367 = arith.divf %365, %366 : vector<12x1xf32>
    %368 = vector.broadcast %367 : vector<12x1xf32> to vector<12x32xf32>
    %369 = arith.subf %363, %368 : vector<12x32xf32>
    %370 = arith.mulf %369, %369 : vector<12x32xf32>
    %cst_159 = arith.constant dense<0.000000e+00> : vector<12xf32>
    %371 = vector.multi_reduction <add>, %370, %cst_159 [1] : vector<12x32xf32> to vector<12xf32>
    %372 = vector.shape_cast %371 : vector<12xf32> to vector<12x1xf32>
    %cst_160 = arith.constant 3.200000e+01 : f32
    %373 = vector.broadcast %cst_160 : f32 to vector<12x1xf32>
    %374 = arith.divf %372, %373 : vector<12x1xf32>
    %375 = vector.broadcast %367 : vector<12x1xf32> to vector<12x32xf32>
    %376 = arith.subf %363, %375 : vector<12x32xf32>
    %cst_161 = arith.constant 9.99999974E-6 : f32
    %377 = vector.broadcast %cst_161 : f32 to vector<12x1xf32>
    %378 = arith.addf %374, %377 : vector<12x1xf32>
    %379 = math.rsqrt %378 : vector<12x1xf32>
    %380 = vector.broadcast %379 : vector<12x1xf32> to vector<12x32xf32>
    %381 = arith.mulf %376, %380 : vector<12x32xf32>
    %382 = vector.broadcast %235 : vector<1x32xf32> to vector<12x32xf32>
    %383 = arith.mulf %381, %382 : vector<12x32xf32>
    %384 = vector.broadcast %237 : vector<1x32xf32> to vector<12x32xf32>
    %385 = arith.addf %383, %384 : vector<12x32xf32>
    %c0_162 = arith.constant 0 : index
    %c0_163 = arith.constant 0 : index
    %386 = vector.load %arg3[%c0_162, %c0_163] : memref<2x32xf32, #tpu.memory_space<vmem>>, vector<2x32xf32>
    %c0_164 = arith.constant 0 : index
    %c0_165 = arith.constant 0 : index
    %387 = vector.load %arg15[%c0_164, %c0_165] : memref<32x32xf32, #tpu.memory_space<vmem>>, vector<32x32xf32>
    %c0_166 = arith.constant 0 : index
    %c0_167 = arith.constant 0 : index
    %388 = vector.load %arg16[%c0_166, %c0_167] : memref<1x32xf32, #tpu.memory_space<vmem>>, vector<1x32xf32>
    %cst_168 = arith.constant dense<0.000000e+00> : vector<2x32xf32>
    %389 = tpu.matmul %386, %387, %cst_168 {dimension_numbers = #tpu.dot_dimension_numbers<[1], [0], [0], [1], [0, 0, 1, 1], [], []>} : vector<2x32xf32>, vector<32x32xf32>, vector<2x32xf32> -> vector<2x32xf32>
    %390 = vector.broadcast %388 : vector<1x32xf32> to vector<2x32xf32>
    %391 = arith.addf %389, %390 : vector<2x32xf32>
    %392 = arith.negf %391 : vector<2x32xf32>
    %393 = math.exp %392 : vector<2x32xf32>
    %cst_169 = arith.constant 1.000000e+00 : f32
    %394 = vector.broadcast %cst_169 : f32 to vector<2x32xf32>
    %395 = arith.addf %394, %393 : vector<2x32xf32>
    %396 = arith.divf %394, %395 : vector<2x32xf32>
    %397 = arith.mulf %391, %396 : vector<2x32xf32>
    %c0_170 = arith.constant 0 : index
    %c0_171 = arith.constant 0 : index
    %398 = vector.load %arg17[%c0_170, %c0_171] : memref<32x32xf32, #tpu.memory_space<vmem>>, vector<32x32xf32>
    %c0_172 = arith.constant 0 : index
    %c0_173 = arith.constant 0 : index
    %399 = vector.load %arg18[%c0_172, %c0_173] : memref<1x32xf32, #tpu.memory_space<vmem>>, vector<1x32xf32>
    %cst_174 = arith.constant dense<0.000000e+00> : vector<2x32xf32>
    %400 = tpu.matmul %397, %398, %cst_174 {dimension_numbers = #tpu.dot_dimension_numbers<[1], [0], [0], [1], [0, 0, 1, 1], [], []>} : vector<2x32xf32>, vector<32x32xf32>, vector<2x32xf32> -> vector<2x32xf32>
    %401 = vector.broadcast %399 : vector<1x32xf32> to vector<2x32xf32>
    %402 = arith.addf %400, %401 : vector<2x32xf32>
    %c0_175 = arith.constant 0 : index
    %c0_176 = arith.constant 0 : index
    %403 = vector.load %arg7[%c0_175, %c0_176] : memref<20x2xf32, #tpu.memory_space<vmem>>, vector<20x2xf32>
    %cst_177 = arith.constant dense<0.000000e+00> : vector<20x32xf32>
    %404 = tpu.matmul %403, %402, %cst_177 {dimension_numbers = #tpu.dot_dimension_numbers<[1], [0], [0], [1], [0, 0, 1, 1], [], []>} : vector<20x2xf32>, vector<2x32xf32>, vector<20x32xf32> -> vector<20x32xf32>
    %c0_178 = arith.constant 0 : index
    %c0_179 = arith.constant 0 : index
    %405 = vector.load %arg8[%c0_178, %c0_179] : memref<20x12xf32, #tpu.memory_space<vmem>>, vector<20x12xf32>
    %cst_180 = arith.constant dense<0.000000e+00> : vector<20x32xf32>
    %406 = tpu.matmul %405, %385, %cst_180 {dimension_numbers = #tpu.dot_dimension_numbers<[1], [0], [0], [1], [0, 0, 1, 1], [], []>} : vector<20x12xf32>, vector<12x32xf32>, vector<20x32xf32> -> vector<20x32xf32>
    %407 = arith.addf %404, %406 : vector<20x32xf32>
    %c0_181 = arith.constant 0 : index
    %c0_182 = arith.constant 0 : index
    %408 = vector.load %arg9[%c0_181, %c0_182] : memref<20x16xf32, #tpu.memory_space<vmem>>, vector<20x16xf32>
    %cst_183 = arith.constant dense<0.000000e+00> : vector<20x32xf32>
    %409 = tpu.matmul %408, %34, %cst_183 {dimension_numbers = #tpu.dot_dimension_numbers<[1], [0], [0], [1], [0, 0, 1, 1], [], []>} : vector<20x16xf32>, vector<16x32xf32>, vector<20x32xf32> -> vector<20x32xf32>
    %410 = arith.addf %407, %409 : vector<20x32xf32>
    %c0_184 = arith.constant 0 : index
    %c0_185 = arith.constant 0 : index
    %411 = vector.load %arg4[%c0_184, %c0_185] : memref<20x32xf32, #tpu.memory_space<vmem>>, vector<20x32xf32>
    %412 = arith.addf %410, %411 : vector<20x32xf32>
    %c0_186 = arith.constant 0 : index
    %c0_187 = arith.constant 0 : index
    %413 = vector.load %arg6[%c0_186, %c0_187] : memref<20x20xf32, #tpu.memory_space<vmem>>, vector<20x20xf32>
    %c0_188 = arith.constant 0 : index
    %c0_189 = arith.constant 0 : index
    %c0_190 = arith.constant 0 : index
    %414 = vector.load %arg33[%c0_188, %c0_189, %c0_190] : memref<2x32x96xf32, #tpu.memory_space<vmem>>, vector<1x32x96xf32>
    %415 = vector.shape_cast %414 : vector<1x32x96xf32> to vector<32x96xf32>
    %c0_191 = arith.constant 0 : index
    %c0_192 = arith.constant 0 : index
    %c0_193 = arith.constant 0 : index
    %416 = vector.load %arg34[%c0_191, %c0_192, %c0_193] : memref<2x1x96xf32, #tpu.memory_space<vmem>>, vector<1x1x96xf32>
    %417 = vector.shape_cast %416 : vector<1x1x96xf32> to vector<1x96xf32>
    %c0_194 = arith.constant 0 : index
    %c0_195 = arith.constant 0 : index
    %c0_196 = arith.constant 0 : index
    %418 = vector.load %arg35[%c0_194, %c0_195, %c0_196] : memref<2x32x32xf32, #tpu.memory_space<vmem>>, vector<1x32x32xf32>
    %419 = vector.shape_cast %418 : vector<1x32x32xf32> to vector<32x32xf32>
    %c0_197 = arith.constant 0 : index
    %c0_198 = arith.constant 0 : index
    %c0_199 = arith.constant 0 : index
    %420 = vector.load %arg36[%c0_197, %c0_198, %c0_199] : memref<2x1x32xf32, #tpu.memory_space<vmem>>, vector<1x1x32xf32>
    %421 = vector.shape_cast %420 : vector<1x1x32xf32> to vector<1x32xf32>
    %c0_200 = arith.constant 0 : index
    %c0_201 = arith.constant 0 : index
    %c0_202 = arith.constant 0 : index
    %422 = vector.load %arg37[%c0_200, %c0_201, %c0_202] : memref<2x32x64xf32, #tpu.memory_space<vmem>>, vector<1x32x64xf32>
    %423 = vector.shape_cast %422 : vector<1x32x64xf32> to vector<32x64xf32>
    %c0_203 = arith.constant 0 : index
    %c0_204 = arith.constant 0 : index
    %c0_205 = arith.constant 0 : index
    %424 = vector.load %arg38[%c0_203, %c0_204, %c0_205] : memref<2x1x64xf32, #tpu.memory_space<vmem>>, vector<1x1x64xf32>
    %425 = vector.shape_cast %424 : vector<1x1x64xf32> to vector<1x64xf32>
    %c0_206 = arith.constant 0 : index
    %c0_207 = arith.constant 0 : index
    %c0_208 = arith.constant 0 : index
    %426 = vector.load %arg39[%c0_206, %c0_207, %c0_208] : memref<2x64x32xf32, #tpu.memory_space<vmem>>, vector<1x64x32xf32>
    %427 = vector.shape_cast %426 : vector<1x64x32xf32> to vector<64x32xf32>
    %c0_209 = arith.constant 0 : index
    %c0_210 = arith.constant 0 : index
    %c0_211 = arith.constant 0 : index
    %428 = vector.load %arg40[%c0_209, %c0_210, %c0_211] : memref<2x1x32xf32, #tpu.memory_space<vmem>>, vector<1x1x32xf32>
    %429 = vector.shape_cast %428 : vector<1x1x32xf32> to vector<1x32xf32>
    %c0_212 = arith.constant 0 : index
    %c0_213 = arith.constant 0 : index
    %c0_214 = arith.constant 0 : index
    %430 = vector.load %arg41[%c0_212, %c0_213, %c0_214] : memref<2x1x32xf32, #tpu.memory_space<vmem>>, vector<1x1x32xf32>
    %431 = vector.shape_cast %430 : vector<1x1x32xf32> to vector<1x32xf32>
    %c0_215 = arith.constant 0 : index
    %c0_216 = arith.constant 0 : index
    %c0_217 = arith.constant 0 : index
    %432 = vector.load %arg42[%c0_215, %c0_216, %c0_217] : memref<2x1x32xf32, #tpu.memory_space<vmem>>, vector<1x1x32xf32>
    %433 = vector.shape_cast %432 : vector<1x1x32xf32> to vector<1x32xf32>
    %c0_218 = arith.constant 0 : index
    %c0_219 = arith.constant 0 : index
    %c0_220 = arith.constant 0 : index
    %434 = vector.load %arg43[%c0_218, %c0_219, %c0_220] : memref<2x1x32xf32, #tpu.memory_space<vmem>>, vector<1x1x32xf32>
    %435 = vector.shape_cast %434 : vector<1x1x32xf32> to vector<1x32xf32>
    %c0_221 = arith.constant 0 : index
    %c0_222 = arith.constant 0 : index
    %c0_223 = arith.constant 0 : index
    %436 = vector.load %arg44[%c0_221, %c0_222, %c0_223] : memref<2x1x32xf32, #tpu.memory_space<vmem>>, vector<1x1x32xf32>
    %437 = vector.shape_cast %436 : vector<1x1x32xf32> to vector<1x32xf32>
    %cst_224 = arith.constant dense<0.000000e+00> : vector<20x96xf32>
    %438 = tpu.matmul %412, %415, %cst_224 {dimension_numbers = #tpu.dot_dimension_numbers<[1], [0], [0], [1], [0, 0, 1, 1], [], []>} : vector<20x32xf32>, vector<32x96xf32>, vector<20x96xf32> -> vector<20x96xf32>
    %439 = vector.broadcast %417 : vector<1x96xf32> to vector<20x96xf32>
    %440 = arith.addf %438, %439 : vector<20x96xf32>
    %441 = vector.extract_strided_slice %440 {offsets = [0, 0], sizes = [20, 32], strides = [1, 1]} : vector<20x96xf32> to vector<20x32xf32>
    %442 = vector.extract_strided_slice %440 {offsets = [0, 32], sizes = [20, 32], strides = [1, 1]} : vector<20x96xf32> to vector<20x32xf32>
    %443 = vector.extract_strided_slice %440 {offsets = [0, 64], sizes = [20, 32], strides = [1, 1]} : vector<20x96xf32> to vector<20x32xf32>
    %444 = vector.broadcast %7 : vector<1x32xf32> to vector<20x32xf32>
    %445 = arith.mulf %441, %444 : vector<20x32xf32>
    %cst_225 = arith.constant dense<0.000000e+00> : vector<20x20xf32>
    %446 = tpu.matmul %445, %442, %cst_225 {dimension_numbers = #tpu.dot_dimension_numbers<[1], [1], [0], [0], [0, 0, 1, 0], [], []>} : vector<20x32xf32>, vector<20x32xf32>, vector<20x20xf32> -> vector<20x20xf32>
    %cst_226 = arith.constant 0.353553385 : f32
    %447 = vector.broadcast %cst_226 : f32 to vector<20x20xf32>
    %448 = arith.mulf %446, %447 : vector<20x20xf32>
    %449 = arith.addf %448, %413 : vector<20x20xf32>
    %cst_227 = arith.constant dense<0xFF800000> : vector<20xf32>
    %450 = vector.multi_reduction <maximumf>, %449, %cst_227 [1] : vector<20x20xf32> to vector<20xf32>
    %451 = vector.shape_cast %450 : vector<20xf32> to vector<20x1xf32>
    %452 = vector.broadcast %451 : vector<20x1xf32> to vector<20x20xf32>
    %453 = arith.subf %449, %452 : vector<20x20xf32>
    %454 = math.exp %453 : vector<20x20xf32>
    %cst_228 = arith.constant dense<0.000000e+00> : vector<20xf32>
    %455 = vector.multi_reduction <add>, %454, %cst_228 [1] : vector<20x20xf32> to vector<20xf32>
    %456 = vector.shape_cast %455 : vector<20xf32> to vector<20x1xf32>
    %457 = tpu.reciprocal %456 {approx = true} : vector<20x1xf32> -> vector<20x1xf32>
    %458 = vector.broadcast %457 : vector<20x1xf32> to vector<20x20xf32>
    %459 = arith.mulf %454, %458 : vector<20x20xf32>
    %460 = vector.broadcast %7 : vector<1x32xf32> to vector<20x32xf32>
    %461 = arith.mulf %443, %460 : vector<20x32xf32>
    %cst_229 = arith.constant dense<0.000000e+00> : vector<20x32xf32>
    %462 = tpu.matmul %459, %461, %cst_229 {dimension_numbers = #tpu.dot_dimension_numbers<[1], [0], [0], [1], [0, 0, 1, 1], [], []>} : vector<20x20xf32>, vector<20x32xf32>, vector<20x32xf32> -> vector<20x32xf32>
    %463 = vector.broadcast %14 : vector<1x32xf32> to vector<20x32xf32>
    %464 = arith.mulf %441, %463 : vector<20x32xf32>
    %cst_230 = arith.constant dense<0.000000e+00> : vector<20x20xf32>
    %465 = tpu.matmul %464, %442, %cst_230 {dimension_numbers = #tpu.dot_dimension_numbers<[1], [1], [0], [0], [0, 0, 1, 0], [], []>} : vector<20x32xf32>, vector<20x32xf32>, vector<20x20xf32> -> vector<20x20xf32>
    %cst_231 = arith.constant 0.353553385 : f32
    %466 = vector.broadcast %cst_231 : f32 to vector<20x20xf32>
    %467 = arith.mulf %465, %466 : vector<20x20xf32>
    %468 = arith.addf %467, %413 : vector<20x20xf32>
    %cst_232 = arith.constant dense<0xFF800000> : vector<20xf32>
    %469 = vector.multi_reduction <maximumf>, %468, %cst_232 [1] : vector<20x20xf32> to vector<20xf32>
    %470 = vector.shape_cast %469 : vector<20xf32> to vector<20x1xf32>
    %471 = vector.broadcast %470 : vector<20x1xf32> to vector<20x20xf32>
    %472 = arith.subf %468, %471 : vector<20x20xf32>
    %473 = math.exp %472 : vector<20x20xf32>
    %cst_233 = arith.constant dense<0.000000e+00> : vector<20xf32>
    %474 = vector.multi_reduction <add>, %473, %cst_233 [1] : vector<20x20xf32> to vector<20xf32>
    %475 = vector.shape_cast %474 : vector<20xf32> to vector<20x1xf32>
    %476 = tpu.reciprocal %475 {approx = true} : vector<20x1xf32> -> vector<20x1xf32>
    %477 = vector.broadcast %476 : vector<20x1xf32> to vector<20x20xf32>
    %478 = arith.mulf %473, %477 : vector<20x20xf32>
    %479 = vector.broadcast %14 : vector<1x32xf32> to vector<20x32xf32>
    %480 = arith.mulf %443, %479 : vector<20x32xf32>
    %cst_234 = arith.constant dense<0.000000e+00> : vector<20x32xf32>
    %481 = tpu.matmul %478, %480, %cst_234 {dimension_numbers = #tpu.dot_dimension_numbers<[1], [0], [0], [1], [0, 0, 1, 1], [], []>} : vector<20x20xf32>, vector<20x32xf32>, vector<20x32xf32> -> vector<20x32xf32>
    %482 = arith.addf %462, %481 : vector<20x32xf32>
    %483 = vector.broadcast %21 : vector<1x32xf32> to vector<20x32xf32>
    %484 = arith.mulf %441, %483 : vector<20x32xf32>
    %cst_235 = arith.constant dense<0.000000e+00> : vector<20x20xf32>
    %485 = tpu.matmul %484, %442, %cst_235 {dimension_numbers = #tpu.dot_dimension_numbers<[1], [1], [0], [0], [0, 0, 1, 0], [], []>} : vector<20x32xf32>, vector<20x32xf32>, vector<20x20xf32> -> vector<20x20xf32>
    %cst_236 = arith.constant 0.353553385 : f32
    %486 = vector.broadcast %cst_236 : f32 to vector<20x20xf32>
    %487 = arith.mulf %485, %486 : vector<20x20xf32>
    %488 = arith.addf %487, %413 : vector<20x20xf32>
    %cst_237 = arith.constant dense<0xFF800000> : vector<20xf32>
    %489 = vector.multi_reduction <maximumf>, %488, %cst_237 [1] : vector<20x20xf32> to vector<20xf32>
    %490 = vector.shape_cast %489 : vector<20xf32> to vector<20x1xf32>
    %491 = vector.broadcast %490 : vector<20x1xf32> to vector<20x20xf32>
    %492 = arith.subf %488, %491 : vector<20x20xf32>
    %493 = math.exp %492 : vector<20x20xf32>
    %cst_238 = arith.constant dense<0.000000e+00> : vector<20xf32>
    %494 = vector.multi_reduction <add>, %493, %cst_238 [1] : vector<20x20xf32> to vector<20xf32>
    %495 = vector.shape_cast %494 : vector<20xf32> to vector<20x1xf32>
    %496 = tpu.reciprocal %495 {approx = true} : vector<20x1xf32> -> vector<20x1xf32>
    %497 = vector.broadcast %496 : vector<20x1xf32> to vector<20x20xf32>
    %498 = arith.mulf %493, %497 : vector<20x20xf32>
    %499 = vector.broadcast %21 : vector<1x32xf32> to vector<20x32xf32>
    %500 = arith.mulf %443, %499 : vector<20x32xf32>
    %cst_239 = arith.constant dense<0.000000e+00> : vector<20x32xf32>
    %501 = tpu.matmul %498, %500, %cst_239 {dimension_numbers = #tpu.dot_dimension_numbers<[1], [0], [0], [1], [0, 0, 1, 1], [], []>} : vector<20x20xf32>, vector<20x32xf32>, vector<20x32xf32> -> vector<20x32xf32>
    %502 = arith.addf %482, %501 : vector<20x32xf32>
    %503 = vector.broadcast %28 : vector<1x32xf32> to vector<20x32xf32>
    %504 = arith.mulf %441, %503 : vector<20x32xf32>
    %cst_240 = arith.constant dense<0.000000e+00> : vector<20x20xf32>
    %505 = tpu.matmul %504, %442, %cst_240 {dimension_numbers = #tpu.dot_dimension_numbers<[1], [1], [0], [0], [0, 0, 1, 0], [], []>} : vector<20x32xf32>, vector<20x32xf32>, vector<20x20xf32> -> vector<20x20xf32>
    %cst_241 = arith.constant 0.353553385 : f32
    %506 = vector.broadcast %cst_241 : f32 to vector<20x20xf32>
    %507 = arith.mulf %505, %506 : vector<20x20xf32>
    %508 = arith.addf %507, %413 : vector<20x20xf32>
    %cst_242 = arith.constant dense<0xFF800000> : vector<20xf32>
    %509 = vector.multi_reduction <maximumf>, %508, %cst_242 [1] : vector<20x20xf32> to vector<20xf32>
    %510 = vector.shape_cast %509 : vector<20xf32> to vector<20x1xf32>
    %511 = vector.broadcast %510 : vector<20x1xf32> to vector<20x20xf32>
    %512 = arith.subf %508, %511 : vector<20x20xf32>
    %513 = math.exp %512 : vector<20x20xf32>
    %cst_243 = arith.constant dense<0.000000e+00> : vector<20xf32>
    %514 = vector.multi_reduction <add>, %513, %cst_243 [1] : vector<20x20xf32> to vector<20xf32>
    %515 = vector.shape_cast %514 : vector<20xf32> to vector<20x1xf32>
    %516 = tpu.reciprocal %515 {approx = true} : vector<20x1xf32> -> vector<20x1xf32>
    %517 = vector.broadcast %516 : vector<20x1xf32> to vector<20x20xf32>
    %518 = arith.mulf %513, %517 : vector<20x20xf32>
    %519 = vector.broadcast %28 : vector<1x32xf32> to vector<20x32xf32>
    %520 = arith.mulf %443, %519 : vector<20x32xf32>
    %cst_244 = arith.constant dense<0.000000e+00> : vector<20x32xf32>
    %521 = tpu.matmul %518, %520, %cst_244 {dimension_numbers = #tpu.dot_dimension_numbers<[1], [0], [0], [1], [0, 0, 1, 1], [], []>} : vector<20x20xf32>, vector<20x32xf32>, vector<20x32xf32> -> vector<20x32xf32>
    %522 = arith.addf %502, %521 : vector<20x32xf32>
    %cst_245 = arith.constant dense<0.000000e+00> : vector<20x32xf32>
    %523 = tpu.matmul %522, %419, %cst_245 {dimension_numbers = #tpu.dot_dimension_numbers<[1], [0], [0], [1], [0, 0, 1, 1], [], []>} : vector<20x32xf32>, vector<32x32xf32>, vector<20x32xf32> -> vector<20x32xf32>
    %524 = vector.broadcast %421 : vector<1x32xf32> to vector<20x32xf32>
    %525 = arith.addf %523, %524 : vector<20x32xf32>
    %526 = arith.addf %412, %525 : vector<20x32xf32>
    %cst_246 = arith.constant dense<0.000000e+00> : vector<20xf32>
    %527 = vector.multi_reduction <add>, %526, %cst_246 [1] : vector<20x32xf32> to vector<20xf32>
    %528 = vector.shape_cast %527 : vector<20xf32> to vector<20x1xf32>
    %cst_247 = arith.constant 3.200000e+01 : f32
    %529 = vector.broadcast %cst_247 : f32 to vector<20x1xf32>
    %530 = arith.divf %528, %529 : vector<20x1xf32>
    %531 = vector.broadcast %530 : vector<20x1xf32> to vector<20x32xf32>
    %532 = arith.subf %526, %531 : vector<20x32xf32>
    %533 = arith.mulf %532, %532 : vector<20x32xf32>
    %cst_248 = arith.constant dense<0.000000e+00> : vector<20xf32>
    %534 = vector.multi_reduction <add>, %533, %cst_248 [1] : vector<20x32xf32> to vector<20xf32>
    %535 = vector.shape_cast %534 : vector<20xf32> to vector<20x1xf32>
    %cst_249 = arith.constant 3.200000e+01 : f32
    %536 = vector.broadcast %cst_249 : f32 to vector<20x1xf32>
    %537 = arith.divf %535, %536 : vector<20x1xf32>
    %538 = vector.broadcast %530 : vector<20x1xf32> to vector<20x32xf32>
    %539 = arith.subf %526, %538 : vector<20x32xf32>
    %cst_250 = arith.constant 9.99999974E-6 : f32
    %540 = vector.broadcast %cst_250 : f32 to vector<20x1xf32>
    %541 = arith.addf %537, %540 : vector<20x1xf32>
    %542 = math.rsqrt %541 : vector<20x1xf32>
    %543 = vector.broadcast %542 : vector<20x1xf32> to vector<20x32xf32>
    %544 = arith.mulf %539, %543 : vector<20x32xf32>
    %545 = vector.broadcast %431 : vector<1x32xf32> to vector<20x32xf32>
    %546 = arith.mulf %544, %545 : vector<20x32xf32>
    %547 = vector.broadcast %433 : vector<1x32xf32> to vector<20x32xf32>
    %548 = arith.addf %546, %547 : vector<20x32xf32>
    %cst_251 = arith.constant dense<0.000000e+00> : vector<20x64xf32>
    %549 = tpu.matmul %548, %423, %cst_251 {dimension_numbers = #tpu.dot_dimension_numbers<[1], [0], [0], [1], [0, 0, 1, 1], [], []>} : vector<20x32xf32>, vector<32x64xf32>, vector<20x64xf32> -> vector<20x64xf32>
    %550 = vector.broadcast %425 : vector<1x64xf32> to vector<20x64xf32>
    %551 = arith.addf %549, %550 : vector<20x64xf32>
    %cst_252 = arith.constant 5.000000e-01 : f32
    %552 = vector.broadcast %cst_252 : f32 to vector<20x64xf32>
    %553 = arith.mulf %552, %551 : vector<20x64xf32>
    %cst_253 = arith.constant 0.707106769 : f32
    %554 = vector.broadcast %cst_253 : f32 to vector<20x64xf32>
    %555 = arith.mulf %551, %554 : vector<20x64xf32>
    %556 = math.erf %555 : vector<20x64xf32>
    %cst_254 = arith.constant 1.000000e+00 : f32
    %557 = vector.broadcast %cst_254 : f32 to vector<20x64xf32>
    %558 = arith.addf %557, %556 : vector<20x64xf32>
    %559 = arith.mulf %553, %558 : vector<20x64xf32>
    %cst_255 = arith.constant dense<0.000000e+00> : vector<20x32xf32>
    %560 = tpu.matmul %559, %427, %cst_255 {dimension_numbers = #tpu.dot_dimension_numbers<[1], [0], [0], [1], [0, 0, 1, 1], [], []>} : vector<20x64xf32>, vector<64x32xf32>, vector<20x32xf32> -> vector<20x32xf32>
    %561 = vector.broadcast %429 : vector<1x32xf32> to vector<20x32xf32>
    %562 = arith.addf %560, %561 : vector<20x32xf32>
    %563 = arith.addf %548, %562 : vector<20x32xf32>
    %cst_256 = arith.constant dense<0.000000e+00> : vector<20xf32>
    %564 = vector.multi_reduction <add>, %563, %cst_256 [1] : vector<20x32xf32> to vector<20xf32>
    %565 = vector.shape_cast %564 : vector<20xf32> to vector<20x1xf32>
    %cst_257 = arith.constant 3.200000e+01 : f32
    %566 = vector.broadcast %cst_257 : f32 to vector<20x1xf32>
    %567 = arith.divf %565, %566 : vector<20x1xf32>
    %568 = vector.broadcast %567 : vector<20x1xf32> to vector<20x32xf32>
    %569 = arith.subf %563, %568 : vector<20x32xf32>
    %570 = arith.mulf %569, %569 : vector<20x32xf32>
    %cst_258 = arith.constant dense<0.000000e+00> : vector<20xf32>
    %571 = vector.multi_reduction <add>, %570, %cst_258 [1] : vector<20x32xf32> to vector<20xf32>
    %572 = vector.shape_cast %571 : vector<20xf32> to vector<20x1xf32>
    %cst_259 = arith.constant 3.200000e+01 : f32
    %573 = vector.broadcast %cst_259 : f32 to vector<20x1xf32>
    %574 = arith.divf %572, %573 : vector<20x1xf32>
    %575 = vector.broadcast %567 : vector<20x1xf32> to vector<20x32xf32>
    %576 = arith.subf %563, %575 : vector<20x32xf32>
    %cst_260 = arith.constant 9.99999974E-6 : f32
    %577 = vector.broadcast %cst_260 : f32 to vector<20x1xf32>
    %578 = arith.addf %574, %577 : vector<20x1xf32>
    %579 = math.rsqrt %578 : vector<20x1xf32>
    %580 = vector.broadcast %579 : vector<20x1xf32> to vector<20x32xf32>
    %581 = arith.mulf %576, %580 : vector<20x32xf32>
    %582 = vector.broadcast %435 : vector<1x32xf32> to vector<20x32xf32>
    %583 = arith.mulf %581, %582 : vector<20x32xf32>
    %584 = vector.broadcast %437 : vector<1x32xf32> to vector<20x32xf32>
    %585 = arith.addf %583, %584 : vector<20x32xf32>
    %c1_261 = arith.constant 1 : index
    %c0_262 = arith.constant 0 : index
    %c0_263 = arith.constant 0 : index
    %586 = vector.load %arg33[%c1_261, %c0_262, %c0_263] : memref<2x32x96xf32, #tpu.memory_space<vmem>>, vector<1x32x96xf32>
    %587 = vector.shape_cast %586 : vector<1x32x96xf32> to vector<32x96xf32>
    %c1_264 = arith.constant 1 : index
    %c0_265 = arith.constant 0 : index
    %c0_266 = arith.constant 0 : index
    %588 = vector.load %arg34[%c1_264, %c0_265, %c0_266] : memref<2x1x96xf32, #tpu.memory_space<vmem>>, vector<1x1x96xf32>
    %589 = vector.shape_cast %588 : vector<1x1x96xf32> to vector<1x96xf32>
    %c1_267 = arith.constant 1 : index
    %c0_268 = arith.constant 0 : index
    %c0_269 = arith.constant 0 : index
    %590 = vector.load %arg35[%c1_267, %c0_268, %c0_269] : memref<2x32x32xf32, #tpu.memory_space<vmem>>, vector<1x32x32xf32>
    %591 = vector.shape_cast %590 : vector<1x32x32xf32> to vector<32x32xf32>
    %c1_270 = arith.constant 1 : index
    %c0_271 = arith.constant 0 : index
    %c0_272 = arith.constant 0 : index
    %592 = vector.load %arg36[%c1_270, %c0_271, %c0_272] : memref<2x1x32xf32, #tpu.memory_space<vmem>>, vector<1x1x32xf32>
    %593 = vector.shape_cast %592 : vector<1x1x32xf32> to vector<1x32xf32>
    %c1_273 = arith.constant 1 : index
    %c0_274 = arith.constant 0 : index
    %c0_275 = arith.constant 0 : index
    %594 = vector.load %arg37[%c1_273, %c0_274, %c0_275] : memref<2x32x64xf32, #tpu.memory_space<vmem>>, vector<1x32x64xf32>
    %595 = vector.shape_cast %594 : vector<1x32x64xf32> to vector<32x64xf32>
    %c1_276 = arith.constant 1 : index
    %c0_277 = arith.constant 0 : index
    %c0_278 = arith.constant 0 : index
    %596 = vector.load %arg38[%c1_276, %c0_277, %c0_278] : memref<2x1x64xf32, #tpu.memory_space<vmem>>, vector<1x1x64xf32>
    %597 = vector.shape_cast %596 : vector<1x1x64xf32> to vector<1x64xf32>
    %c1_279 = arith.constant 1 : index
    %c0_280 = arith.constant 0 : index
    %c0_281 = arith.constant 0 : index
    %598 = vector.load %arg39[%c1_279, %c0_280, %c0_281] : memref<2x64x32xf32, #tpu.memory_space<vmem>>, vector<1x64x32xf32>
    %599 = vector.shape_cast %598 : vector<1x64x32xf32> to vector<64x32xf32>
    %c1_282 = arith.constant 1 : index
    %c0_283 = arith.constant 0 : index
    %c0_284 = arith.constant 0 : index
    %600 = vector.load %arg40[%c1_282, %c0_283, %c0_284] : memref<2x1x32xf32, #tpu.memory_space<vmem>>, vector<1x1x32xf32>
    %601 = vector.shape_cast %600 : vector<1x1x32xf32> to vector<1x32xf32>
    %c1_285 = arith.constant 1 : index
    %c0_286 = arith.constant 0 : index
    %c0_287 = arith.constant 0 : index
    %602 = vector.load %arg41[%c1_285, %c0_286, %c0_287] : memref<2x1x32xf32, #tpu.memory_space<vmem>>, vector<1x1x32xf32>
    %603 = vector.shape_cast %602 : vector<1x1x32xf32> to vector<1x32xf32>
    %c1_288 = arith.constant 1 : index
    %c0_289 = arith.constant 0 : index
    %c0_290 = arith.constant 0 : index
    %604 = vector.load %arg42[%c1_288, %c0_289, %c0_290] : memref<2x1x32xf32, #tpu.memory_space<vmem>>, vector<1x1x32xf32>
    %605 = vector.shape_cast %604 : vector<1x1x32xf32> to vector<1x32xf32>
    %c1_291 = arith.constant 1 : index
    %c0_292 = arith.constant 0 : index
    %c0_293 = arith.constant 0 : index
    %606 = vector.load %arg43[%c1_291, %c0_292, %c0_293] : memref<2x1x32xf32, #tpu.memory_space<vmem>>, vector<1x1x32xf32>
    %607 = vector.shape_cast %606 : vector<1x1x32xf32> to vector<1x32xf32>
    %c1_294 = arith.constant 1 : index
    %c0_295 = arith.constant 0 : index
    %c0_296 = arith.constant 0 : index
    %608 = vector.load %arg44[%c1_294, %c0_295, %c0_296] : memref<2x1x32xf32, #tpu.memory_space<vmem>>, vector<1x1x32xf32>
    %609 = vector.shape_cast %608 : vector<1x1x32xf32> to vector<1x32xf32>
    %cst_297 = arith.constant dense<0.000000e+00> : vector<20x96xf32>
    %610 = tpu.matmul %585, %587, %cst_297 {dimension_numbers = #tpu.dot_dimension_numbers<[1], [0], [0], [1], [0, 0, 1, 1], [], []>} : vector<20x32xf32>, vector<32x96xf32>, vector<20x96xf32> -> vector<20x96xf32>
    %611 = vector.broadcast %589 : vector<1x96xf32> to vector<20x96xf32>
    %612 = arith.addf %610, %611 : vector<20x96xf32>
    %613 = vector.extract_strided_slice %612 {offsets = [0, 0], sizes = [20, 32], strides = [1, 1]} : vector<20x96xf32> to vector<20x32xf32>
    %614 = vector.extract_strided_slice %612 {offsets = [0, 32], sizes = [20, 32], strides = [1, 1]} : vector<20x96xf32> to vector<20x32xf32>
    %615 = vector.extract_strided_slice %612 {offsets = [0, 64], sizes = [20, 32], strides = [1, 1]} : vector<20x96xf32> to vector<20x32xf32>
    %616 = vector.broadcast %7 : vector<1x32xf32> to vector<20x32xf32>
    %617 = arith.mulf %613, %616 : vector<20x32xf32>
    %cst_298 = arith.constant dense<0.000000e+00> : vector<20x20xf32>
    %618 = tpu.matmul %617, %614, %cst_298 {dimension_numbers = #tpu.dot_dimension_numbers<[1], [1], [0], [0], [0, 0, 1, 0], [], []>} : vector<20x32xf32>, vector<20x32xf32>, vector<20x20xf32> -> vector<20x20xf32>
    %cst_299 = arith.constant 0.353553385 : f32
    %619 = vector.broadcast %cst_299 : f32 to vector<20x20xf32>
    %620 = arith.mulf %618, %619 : vector<20x20xf32>
    %621 = arith.addf %620, %413 : vector<20x20xf32>
    %cst_300 = arith.constant dense<0xFF800000> : vector<20xf32>
    %622 = vector.multi_reduction <maximumf>, %621, %cst_300 [1] : vector<20x20xf32> to vector<20xf32>
    %623 = vector.shape_cast %622 : vector<20xf32> to vector<20x1xf32>
    %624 = vector.broadcast %623 : vector<20x1xf32> to vector<20x20xf32>
    %625 = arith.subf %621, %624 : vector<20x20xf32>
    %626 = math.exp %625 : vector<20x20xf32>
    %cst_301 = arith.constant dense<0.000000e+00> : vector<20xf32>
    %627 = vector.multi_reduction <add>, %626, %cst_301 [1] : vector<20x20xf32> to vector<20xf32>
    %628 = vector.shape_cast %627 : vector<20xf32> to vector<20x1xf32>
    %629 = tpu.reciprocal %628 {approx = true} : vector<20x1xf32> -> vector<20x1xf32>
    %630 = vector.broadcast %629 : vector<20x1xf32> to vector<20x20xf32>
    %631 = arith.mulf %626, %630 : vector<20x20xf32>
    %632 = vector.broadcast %7 : vector<1x32xf32> to vector<20x32xf32>
    %633 = arith.mulf %615, %632 : vector<20x32xf32>
    %cst_302 = arith.constant dense<0.000000e+00> : vector<20x32xf32>
    %634 = tpu.matmul %631, %633, %cst_302 {dimension_numbers = #tpu.dot_dimension_numbers<[1], [0], [0], [1], [0, 0, 1, 1], [], []>} : vector<20x20xf32>, vector<20x32xf32>, vector<20x32xf32> -> vector<20x32xf32>
    %635 = vector.broadcast %14 : vector<1x32xf32> to vector<20x32xf32>
    %636 = arith.mulf %613, %635 : vector<20x32xf32>
    %cst_303 = arith.constant dense<0.000000e+00> : vector<20x20xf32>
    %637 = tpu.matmul %636, %614, %cst_303 {dimension_numbers = #tpu.dot_dimension_numbers<[1], [1], [0], [0], [0, 0, 1, 0], [], []>} : vector<20x32xf32>, vector<20x32xf32>, vector<20x20xf32> -> vector<20x20xf32>
    %cst_304 = arith.constant 0.353553385 : f32
    %638 = vector.broadcast %cst_304 : f32 to vector<20x20xf32>
    %639 = arith.mulf %637, %638 : vector<20x20xf32>
    %640 = arith.addf %639, %413 : vector<20x20xf32>
    %cst_305 = arith.constant dense<0xFF800000> : vector<20xf32>
    %641 = vector.multi_reduction <maximumf>, %640, %cst_305 [1] : vector<20x20xf32> to vector<20xf32>
    %642 = vector.shape_cast %641 : vector<20xf32> to vector<20x1xf32>
    %643 = vector.broadcast %642 : vector<20x1xf32> to vector<20x20xf32>
    %644 = arith.subf %640, %643 : vector<20x20xf32>
    %645 = math.exp %644 : vector<20x20xf32>
    %cst_306 = arith.constant dense<0.000000e+00> : vector<20xf32>
    %646 = vector.multi_reduction <add>, %645, %cst_306 [1] : vector<20x20xf32> to vector<20xf32>
    %647 = vector.shape_cast %646 : vector<20xf32> to vector<20x1xf32>
    %648 = tpu.reciprocal %647 {approx = true} : vector<20x1xf32> -> vector<20x1xf32>
    %649 = vector.broadcast %648 : vector<20x1xf32> to vector<20x20xf32>
    %650 = arith.mulf %645, %649 : vector<20x20xf32>
    %651 = vector.broadcast %14 : vector<1x32xf32> to vector<20x32xf32>
    %652 = arith.mulf %615, %651 : vector<20x32xf32>
    %cst_307 = arith.constant dense<0.000000e+00> : vector<20x32xf32>
    %653 = tpu.matmul %650, %652, %cst_307 {dimension_numbers = #tpu.dot_dimension_numbers<[1], [0], [0], [1], [0, 0, 1, 1], [], []>} : vector<20x20xf32>, vector<20x32xf32>, vector<20x32xf32> -> vector<20x32xf32>
    %654 = arith.addf %634, %653 : vector<20x32xf32>
    %655 = vector.broadcast %21 : vector<1x32xf32> to vector<20x32xf32>
    %656 = arith.mulf %613, %655 : vector<20x32xf32>
    %cst_308 = arith.constant dense<0.000000e+00> : vector<20x20xf32>
    %657 = tpu.matmul %656, %614, %cst_308 {dimension_numbers = #tpu.dot_dimension_numbers<[1], [1], [0], [0], [0, 0, 1, 0], [], []>} : vector<20x32xf32>, vector<20x32xf32>, vector<20x20xf32> -> vector<20x20xf32>
    %cst_309 = arith.constant 0.353553385 : f32
    %658 = vector.broadcast %cst_309 : f32 to vector<20x20xf32>
    %659 = arith.mulf %657, %658 : vector<20x20xf32>
    %660 = arith.addf %659, %413 : vector<20x20xf32>
    %cst_310 = arith.constant dense<0xFF800000> : vector<20xf32>
    %661 = vector.multi_reduction <maximumf>, %660, %cst_310 [1] : vector<20x20xf32> to vector<20xf32>
    %662 = vector.shape_cast %661 : vector<20xf32> to vector<20x1xf32>
    %663 = vector.broadcast %662 : vector<20x1xf32> to vector<20x20xf32>
    %664 = arith.subf %660, %663 : vector<20x20xf32>
    %665 = math.exp %664 : vector<20x20xf32>
    %cst_311 = arith.constant dense<0.000000e+00> : vector<20xf32>
    %666 = vector.multi_reduction <add>, %665, %cst_311 [1] : vector<20x20xf32> to vector<20xf32>
    %667 = vector.shape_cast %666 : vector<20xf32> to vector<20x1xf32>
    %668 = tpu.reciprocal %667 {approx = true} : vector<20x1xf32> -> vector<20x1xf32>
    %669 = vector.broadcast %668 : vector<20x1xf32> to vector<20x20xf32>
    %670 = arith.mulf %665, %669 : vector<20x20xf32>
    %671 = vector.broadcast %21 : vector<1x32xf32> to vector<20x32xf32>
    %672 = arith.mulf %615, %671 : vector<20x32xf32>
    %cst_312 = arith.constant dense<0.000000e+00> : vector<20x32xf32>
    %673 = tpu.matmul %670, %672, %cst_312 {dimension_numbers = #tpu.dot_dimension_numbers<[1], [0], [0], [1], [0, 0, 1, 1], [], []>} : vector<20x20xf32>, vector<20x32xf32>, vector<20x32xf32> -> vector<20x32xf32>
    %674 = arith.addf %654, %673 : vector<20x32xf32>
    %675 = vector.broadcast %28 : vector<1x32xf32> to vector<20x32xf32>
    %676 = arith.mulf %613, %675 : vector<20x32xf32>
    %cst_313 = arith.constant dense<0.000000e+00> : vector<20x20xf32>
    %677 = tpu.matmul %676, %614, %cst_313 {dimension_numbers = #tpu.dot_dimension_numbers<[1], [1], [0], [0], [0, 0, 1, 0], [], []>} : vector<20x32xf32>, vector<20x32xf32>, vector<20x20xf32> -> vector<20x20xf32>
    %cst_314 = arith.constant 0.353553385 : f32
    %678 = vector.broadcast %cst_314 : f32 to vector<20x20xf32>
    %679 = arith.mulf %677, %678 : vector<20x20xf32>
    %680 = arith.addf %679, %413 : vector<20x20xf32>
    %cst_315 = arith.constant dense<0xFF800000> : vector<20xf32>
    %681 = vector.multi_reduction <maximumf>, %680, %cst_315 [1] : vector<20x20xf32> to vector<20xf32>
    %682 = vector.shape_cast %681 : vector<20xf32> to vector<20x1xf32>
    %683 = vector.broadcast %682 : vector<20x1xf32> to vector<20x20xf32>
    %684 = arith.subf %680, %683 : vector<20x20xf32>
    %685 = math.exp %684 : vector<20x20xf32>
    %cst_316 = arith.constant dense<0.000000e+00> : vector<20xf32>
    %686 = vector.multi_reduction <add>, %685, %cst_316 [1] : vector<20x20xf32> to vector<20xf32>
    %687 = vector.shape_cast %686 : vector<20xf32> to vector<20x1xf32>
    %688 = tpu.reciprocal %687 {approx = true} : vector<20x1xf32> -> vector<20x1xf32>
    %689 = vector.broadcast %688 : vector<20x1xf32> to vector<20x20xf32>
    %690 = arith.mulf %685, %689 : vector<20x20xf32>
    %691 = vector.broadcast %28 : vector<1x32xf32> to vector<20x32xf32>
    %692 = arith.mulf %615, %691 : vector<20x32xf32>
    %cst_317 = arith.constant dense<0.000000e+00> : vector<20x32xf32>
    %693 = tpu.matmul %690, %692, %cst_317 {dimension_numbers = #tpu.dot_dimension_numbers<[1], [0], [0], [1], [0, 0, 1, 1], [], []>} : vector<20x20xf32>, vector<20x32xf32>, vector<20x32xf32> -> vector<20x32xf32>
    %694 = arith.addf %674, %693 : vector<20x32xf32>
    %cst_318 = arith.constant dense<0.000000e+00> : vector<20x32xf32>
    %695 = tpu.matmul %694, %591, %cst_318 {dimension_numbers = #tpu.dot_dimension_numbers<[1], [0], [0], [1], [0, 0, 1, 1], [], []>} : vector<20x32xf32>, vector<32x32xf32>, vector<20x32xf32> -> vector<20x32xf32>
    %696 = vector.broadcast %593 : vector<1x32xf32> to vector<20x32xf32>
    %697 = arith.addf %695, %696 : vector<20x32xf32>
    %698 = arith.addf %585, %697 : vector<20x32xf32>
    %cst_319 = arith.constant dense<0.000000e+00> : vector<20xf32>
    %699 = vector.multi_reduction <add>, %698, %cst_319 [1] : vector<20x32xf32> to vector<20xf32>
    %700 = vector.shape_cast %699 : vector<20xf32> to vector<20x1xf32>
    %cst_320 = arith.constant 3.200000e+01 : f32
    %701 = vector.broadcast %cst_320 : f32 to vector<20x1xf32>
    %702 = arith.divf %700, %701 : vector<20x1xf32>
    %703 = vector.broadcast %702 : vector<20x1xf32> to vector<20x32xf32>
    %704 = arith.subf %698, %703 : vector<20x32xf32>
    %705 = arith.mulf %704, %704 : vector<20x32xf32>
    %cst_321 = arith.constant dense<0.000000e+00> : vector<20xf32>
    %706 = vector.multi_reduction <add>, %705, %cst_321 [1] : vector<20x32xf32> to vector<20xf32>
    %707 = vector.shape_cast %706 : vector<20xf32> to vector<20x1xf32>
    %cst_322 = arith.constant 3.200000e+01 : f32
    %708 = vector.broadcast %cst_322 : f32 to vector<20x1xf32>
    %709 = arith.divf %707, %708 : vector<20x1xf32>
    %710 = vector.broadcast %702 : vector<20x1xf32> to vector<20x32xf32>
    %711 = arith.subf %698, %710 : vector<20x32xf32>
    %cst_323 = arith.constant 9.99999974E-6 : f32
    %712 = vector.broadcast %cst_323 : f32 to vector<20x1xf32>
    %713 = arith.addf %709, %712 : vector<20x1xf32>
    %714 = math.rsqrt %713 : vector<20x1xf32>
    %715 = vector.broadcast %714 : vector<20x1xf32> to vector<20x32xf32>
    %716 = arith.mulf %711, %715 : vector<20x32xf32>
    %717 = vector.broadcast %603 : vector<1x32xf32> to vector<20x32xf32>
    %718 = arith.mulf %716, %717 : vector<20x32xf32>
    %719 = vector.broadcast %605 : vector<1x32xf32> to vector<20x32xf32>
    %720 = arith.addf %718, %719 : vector<20x32xf32>
    %cst_324 = arith.constant dense<0.000000e+00> : vector<20x64xf32>
    %721 = tpu.matmul %720, %595, %cst_324 {dimension_numbers = #tpu.dot_dimension_numbers<[1], [0], [0], [1], [0, 0, 1, 1], [], []>} : vector<20x32xf32>, vector<32x64xf32>, vector<20x64xf32> -> vector<20x64xf32>
    %722 = vector.broadcast %597 : vector<1x64xf32> to vector<20x64xf32>
    %723 = arith.addf %721, %722 : vector<20x64xf32>
    %cst_325 = arith.constant 5.000000e-01 : f32
    %724 = vector.broadcast %cst_325 : f32 to vector<20x64xf32>
    %725 = arith.mulf %724, %723 : vector<20x64xf32>
    %cst_326 = arith.constant 0.707106769 : f32
    %726 = vector.broadcast %cst_326 : f32 to vector<20x64xf32>
    %727 = arith.mulf %723, %726 : vector<20x64xf32>
    %728 = math.erf %727 : vector<20x64xf32>
    %cst_327 = arith.constant 1.000000e+00 : f32
    %729 = vector.broadcast %cst_327 : f32 to vector<20x64xf32>
    %730 = arith.addf %729, %728 : vector<20x64xf32>
    %731 = arith.mulf %725, %730 : vector<20x64xf32>
    %cst_328 = arith.constant dense<0.000000e+00> : vector<20x32xf32>
    %732 = tpu.matmul %731, %599, %cst_328 {dimension_numbers = #tpu.dot_dimension_numbers<[1], [0], [0], [1], [0, 0, 1, 1], [], []>} : vector<20x64xf32>, vector<64x32xf32>, vector<20x32xf32> -> vector<20x32xf32>
    %733 = vector.broadcast %601 : vector<1x32xf32> to vector<20x32xf32>
    %734 = arith.addf %732, %733 : vector<20x32xf32>
    %735 = arith.addf %720, %734 : vector<20x32xf32>
    %cst_329 = arith.constant dense<0.000000e+00> : vector<20xf32>
    %736 = vector.multi_reduction <add>, %735, %cst_329 [1] : vector<20x32xf32> to vector<20xf32>
    %737 = vector.shape_cast %736 : vector<20xf32> to vector<20x1xf32>
    %cst_330 = arith.constant 3.200000e+01 : f32
    %738 = vector.broadcast %cst_330 : f32 to vector<20x1xf32>
    %739 = arith.divf %737, %738 : vector<20x1xf32>
    %740 = vector.broadcast %739 : vector<20x1xf32> to vector<20x32xf32>
    %741 = arith.subf %735, %740 : vector<20x32xf32>
    %742 = arith.mulf %741, %741 : vector<20x32xf32>
    %cst_331 = arith.constant dense<0.000000e+00> : vector<20xf32>
    %743 = vector.multi_reduction <add>, %742, %cst_331 [1] : vector<20x32xf32> to vector<20xf32>
    %744 = vector.shape_cast %743 : vector<20xf32> to vector<20x1xf32>
    %cst_332 = arith.constant 3.200000e+01 : f32
    %745 = vector.broadcast %cst_332 : f32 to vector<20x1xf32>
    %746 = arith.divf %744, %745 : vector<20x1xf32>
    %747 = vector.broadcast %739 : vector<20x1xf32> to vector<20x32xf32>
    %748 = arith.subf %735, %747 : vector<20x32xf32>
    %cst_333 = arith.constant 9.99999974E-6 : f32
    %749 = vector.broadcast %cst_333 : f32 to vector<20x1xf32>
    %750 = arith.addf %746, %749 : vector<20x1xf32>
    %751 = math.rsqrt %750 : vector<20x1xf32>
    %752 = vector.broadcast %751 : vector<20x1xf32> to vector<20x32xf32>
    %753 = arith.mulf %748, %752 : vector<20x32xf32>
    %754 = vector.broadcast %607 : vector<1x32xf32> to vector<20x32xf32>
    %755 = arith.mulf %753, %754 : vector<20x32xf32>
    %756 = vector.broadcast %609 : vector<1x32xf32> to vector<20x32xf32>
    %757 = arith.addf %755, %756 : vector<20x32xf32>
    %c0_334 = arith.constant 0 : index
    %c0_335 = arith.constant 0 : index
    %758 = vector.load %arg10[%c0_334, %c0_335] : memref<16x20xf32, #tpu.memory_space<vmem>>, vector<16x20xf32>
    %cst_336 = arith.constant dense<0.000000e+00> : vector<16x32xf32>
    %759 = tpu.matmul %758, %757, %cst_336 {dimension_numbers = #tpu.dot_dimension_numbers<[1], [0], [0], [1], [0, 0, 1, 1], [], []>} : vector<16x20xf32>, vector<20x32xf32>, vector<16x32xf32> -> vector<16x32xf32>
    %c0_337 = arith.constant 0 : index
    %c0_338 = arith.constant 0 : index
    %760 = vector.load %arg19[%c0_337, %c0_338] : memref<32x8xf32, #tpu.memory_space<vmem>>, vector<32x8xf32>
    %c0_339 = arith.constant 0 : index
    %c0_340 = arith.constant 0 : index
    %761 = vector.load %arg20[%c0_339, %c0_340] : memref<1x8xf32, #tpu.memory_space<vmem>>, vector<1x8xf32>
    %cst_341 = arith.constant dense<0.000000e+00> : vector<16x8xf32>
    %762 = tpu.matmul %759, %760, %cst_341 {dimension_numbers = #tpu.dot_dimension_numbers<[1], [0], [0], [1], [0, 0, 1, 1], [], []>} : vector<16x32xf32>, vector<32x8xf32>, vector<16x8xf32> -> vector<16x8xf32>
    %763 = vector.broadcast %761 : vector<1x8xf32> to vector<16x8xf32>
    %764 = arith.addf %762, %763 : vector<16x8xf32>
    %c0_342 = arith.constant 0 : index
    %c0_343 = arith.constant 0 : index
    %765 = vector.load %arg45[%c0_342, %c0_343] : memref<16x8xf32, #tpu.memory_space<vmem>>, vector<16x8xf32>
    tpu.vector_store %arg45[%c0_342, %c0_343], %764 {strides = array<i32>} : memref<16x8xf32, #tpu.memory_space<vmem>>, vector<16x8xf32>,
    return
  }
  func.func @transform_0(%arg0: i32) -> (i32, i32) {
    %c0_i32 = arith.constant 0 : i32
    %c0_i32_0 = arith.constant 0 : i32
    %c0_i32_1 = arith.constant 0 : i32
    return %c0_i32, %c0_i32_0 : i32, i32
  }
  func.func @transform_1(%arg0: i32) -> (i32, i32) {
    %c0_i32 = arith.constant 0 : i32
    %c0_i32_0 = arith.constant 0 : i32
    %c0_i32_1 = arith.constant 0 : i32
    return %c0_i32, %c0_i32_0 : i32, i32
  }
  func.func @transform_2(%arg0: i32) -> (i32, i32) {
    %c0_i32 = arith.constant 0 : i32
    %c0_i32_0 = arith.constant 0 : i32
    %c0_i32_1 = arith.constant 0 : i32
    return %c0_i32, %c0_i32_0 : i32, i32
  }
  func.func @transform_3(%arg0: i32) -> (i32, i32) {
    %c0_i32 = arith.constant 0 : i32
    %c0_i32_0 = arith.constant 0 : i32
    %c0_i32_1 = arith.constant 0 : i32
    return %c0_i32, %c0_i32_0 : i32, i32
  }
  func.func @transform_4(%arg0: i32) -> (i32, i32) {
    %c0_i32 = arith.constant 0 : i32
    %c0_i32_0 = arith.constant 0 : i32
    %c0_i32_1 = arith.constant 0 : i32
    return %c0_i32, %c0_i32_0 : i32, i32
  }
  func.func @transform_5(%arg0: i32) -> (i32, i32) {
    %c0_i32 = arith.constant 0 : i32
    %c0_i32_0 = arith.constant 0 : i32
    %c0_i32_1 = arith.constant 0 : i32
    return %c0_i32, %c0_i32_0 : i32, i32
  }
  func.func @transform_6(%arg0: i32) -> (i32, i32) {
    %c0_i32 = arith.constant 0 : i32
    %c0_i32_0 = arith.constant 0 : i32
    %c0_i32_1 = arith.constant 0 : i32
    return %c0_i32, %c0_i32_0 : i32, i32
  }
  func.func @transform_7(%arg0: i32) -> (i32, i32) {
    %c0_i32 = arith.constant 0 : i32
    %c0_i32_0 = arith.constant 0 : i32
    %c0_i32_1 = arith.constant 0 : i32
    return %c0_i32, %c0_i32_0 : i32, i32
  }
  func.func @transform_8(%arg0: i32) -> (i32, i32) {
    %c0_i32 = arith.constant 0 : i32
    %c0_i32_0 = arith.constant 0 : i32
    %c0_i32_1 = arith.constant 0 : i32
    return %c0_i32, %c0_i32_0 : i32, i32
  }
  func.func @transform_9(%arg0: i32) -> (i32, i32) {
    %c0_i32 = arith.constant 0 : i32
    %c0_i32_0 = arith.constant 0 : i32
    %c0_i32_1 = arith.constant 0 : i32
    return %c0_i32, %c0_i32_0 : i32, i32
  }
  func.func @transform_10(%arg0: i32) -> (i32, i32) {
    %c0_i32 = arith.constant 0 : i32
    %c0_i32_0 = arith.constant 0 : i32
    %c0_i32_1 = arith.constant 0 : i32
    return %c0_i32, %c0_i32_0 : i32, i32
  }
  func.func @transform_11(%arg0: i32) -> (i32, i32) {
    %c0_i32 = arith.constant 0 : i32
    %c0_i32_0 = arith.constant 0 : i32
    %c0_i32_1 = arith.constant 0 : i32
    return %c0_i32, %c0_i32_0 : i32, i32
  }
  func.func @transform_12(%arg0: i32) -> (i32, i32) {
    %c0_i32 = arith.constant 0 : i32
    %c0_i32_0 = arith.constant 0 : i32
    %c0_i32_1 = arith.constant 0 : i32
    return %c0_i32, %c0_i32_0 : i32, i32
  }
  func.func @transform_13(%arg0: i32) -> (i32, i32) {
    %c0_i32 = arith.constant 0 : i32
    %c0_i32_0 = arith.constant 0 : i32
    %c0_i32_1 = arith.constant 0 : i32
    return %c0_i32, %c0_i32_0 : i32, i32
  }
  func.func @transform_14(%arg0: i32) -> (i32, i32) {
    %c0_i32 = arith.constant 0 : i32
    %c0_i32_0 = arith.constant 0 : i32
    %c0_i32_1 = arith.constant 0 : i32
    return %c0_i32, %c0_i32_0 : i32, i32
  }
  func.func @transform_15(%arg0: i32) -> (i32, i32) {
    %c0_i32 = arith.constant 0 : i32
    %c0_i32_0 = arith.constant 0 : i32
    %c0_i32_1 = arith.constant 0 : i32
    return %c0_i32, %c0_i32_0 : i32, i32
  }
  func.func @transform_16(%arg0: i32) -> (i32, i32) {
    %c0_i32 = arith.constant 0 : i32
    %c0_i32_0 = arith.constant 0 : i32
    %c0_i32_1 = arith.constant 0 : i32
    return %c0_i32, %c0_i32_0 : i32, i32
  }
  func.func @transform_17(%arg0: i32) -> (i32, i32) {
    %c0_i32 = arith.constant 0 : i32
    %c0_i32_0 = arith.constant 0 : i32
    %c0_i32_1 = arith.constant 0 : i32
    return %c0_i32, %c0_i32_0 : i32, i32
  }
  func.func @transform_18(%arg0: i32) -> (i32, i32) {
    %c0_i32 = arith.constant 0 : i32
    %c0_i32_0 = arith.constant 0 : i32
    %c0_i32_1 = arith.constant 0 : i32
    return %c0_i32, %c0_i32_0 : i32, i32
  }
  func.func @transform_19(%arg0: i32) -> (i32, i32) {
    %c0_i32 = arith.constant 0 : i32
    %c0_i32_0 = arith.constant 0 : i32
    %c0_i32_1 = arith.constant 0 : i32
    return %c0_i32, %c0_i32_0 : i32, i32
  }
  func.func @transform_20(%arg0: i32) -> (i32, i32, i32) {
    %c0_i32 = arith.constant 0 : i32
    %c0_i32_0 = arith.constant 0 : i32
    %c0_i32_1 = arith.constant 0 : i32
    %c0_i32_2 = arith.constant 0 : i32
    return %c0_i32, %c0_i32_0, %c0_i32_1 : i32, i32, i32
  }
  func.func @transform_21(%arg0: i32) -> (i32, i32, i32) {
    %c0_i32 = arith.constant 0 : i32
    %c0_i32_0 = arith.constant 0 : i32
    %c0_i32_1 = arith.constant 0 : i32
    %c0_i32_2 = arith.constant 0 : i32
    return %c0_i32, %c0_i32_0, %c0_i32_1 : i32, i32, i32
  }
  func.func @transform_22(%arg0: i32) -> (i32, i32, i32) {
    %c0_i32 = arith.constant 0 : i32
    %c0_i32_0 = arith.constant 0 : i32
    %c0_i32_1 = arith.constant 0 : i32
    %c0_i32_2 = arith.constant 0 : i32
    return %c0_i32, %c0_i32_0, %c0_i32_1 : i32, i32, i32
  }
  func.func @transform_23(%arg0: i32) -> (i32, i32, i32) {
    %c0_i32 = arith.constant 0 : i32
    %c0_i32_0 = arith.constant 0 : i32
    %c0_i32_1 = arith.constant 0 : i32
    %c0_i32_2 = arith.constant 0 : i32
    return %c0_i32, %c0_i32_0, %c0_i32_1 : i32, i32, i32
  }
  func.func @transform_24(%arg0: i32) -> (i32, i32, i32) {
    %c0_i32 = arith.constant 0 : i32
    %c0_i32_0 = arith.constant 0 : i32
    %c0_i32_1 = arith.constant 0 : i32
    %c0_i32_2 = arith.constant 0 : i32
    return %c0_i32, %c0_i32_0, %c0_i32_1 : i32, i32, i32
  }
  func.func @transform_25(%arg0: i32) -> (i32, i32, i32) {
    %c0_i32 = arith.constant 0 : i32
    %c0_i32_0 = arith.constant 0 : i32
    %c0_i32_1 = arith.constant 0 : i32
    %c0_i32_2 = arith.constant 0 : i32
    return %c0_i32, %c0_i32_0, %c0_i32_1 : i32, i32, i32
  }
  func.func @transform_26(%arg0: i32) -> (i32, i32, i32) {
    %c0_i32 = arith.constant 0 : i32
    %c0_i32_0 = arith.constant 0 : i32
    %c0_i32_1 = arith.constant 0 : i32
    %c0_i32_2 = arith.constant 0 : i32
    return %c0_i32, %c0_i32_0, %c0_i32_1 : i32, i32, i32
  }
  func.func @transform_27(%arg0: i32) -> (i32, i32, i32) {
    %c0_i32 = arith.constant 0 : i32
    %c0_i32_0 = arith.constant 0 : i32
    %c0_i32_1 = arith.constant 0 : i32
    %c0_i32_2 = arith.constant 0 : i32
    return %c0_i32, %c0_i32_0, %c0_i32_1 : i32, i32, i32
  }
  func.func @transform_28(%arg0: i32) -> (i32, i32, i32) {
    %c0_i32 = arith.constant 0 : i32
    %c0_i32_0 = arith.constant 0 : i32
    %c0_i32_1 = arith.constant 0 : i32
    %c0_i32_2 = arith.constant 0 : i32
    return %c0_i32, %c0_i32_0, %c0_i32_1 : i32, i32, i32
  }
  func.func @transform_29(%arg0: i32) -> (i32, i32, i32) {
    %c0_i32 = arith.constant 0 : i32
    %c0_i32_0 = arith.constant 0 : i32
    %c0_i32_1 = arith.constant 0 : i32
    %c0_i32_2 = arith.constant 0 : i32
    return %c0_i32, %c0_i32_0, %c0_i32_1 : i32, i32, i32
  }
  func.func @transform_30(%arg0: i32) -> (i32, i32, i32) {
    %c0_i32 = arith.constant 0 : i32
    %c0_i32_0 = arith.constant 0 : i32
    %c0_i32_1 = arith.constant 0 : i32
    %c0_i32_2 = arith.constant 0 : i32
    return %c0_i32, %c0_i32_0, %c0_i32_1 : i32, i32, i32
  }
  func.func @transform_31(%arg0: i32) -> (i32, i32, i32) {
    %c0_i32 = arith.constant 0 : i32
    %c0_i32_0 = arith.constant 0 : i32
    %c0_i32_1 = arith.constant 0 : i32
    %c0_i32_2 = arith.constant 0 : i32
    return %c0_i32, %c0_i32_0, %c0_i32_1 : i32, i32, i32
  }
  func.func @transform_32(%arg0: i32) -> (i32, i32, i32) {
    %c0_i32 = arith.constant 0 : i32
    %c0_i32_0 = arith.constant 0 : i32
    %c0_i32_1 = arith.constant 0 : i32
    %c0_i32_2 = arith.constant 0 : i32
    return %c0_i32, %c0_i32_0, %c0_i32_1 : i32, i32, i32
  }
  func.func @transform_33(%arg0: i32) -> (i32, i32, i32) {
    %c0_i32 = arith.constant 0 : i32
    %c0_i32_0 = arith.constant 0 : i32
    %c0_i32_1 = arith.constant 0 : i32
    %c0_i32_2 = arith.constant 0 : i32
    return %c0_i32, %c0_i32_0, %c0_i32_1 : i32, i32, i32
  }
  func.func @transform_34(%arg0: i32) -> (i32, i32, i32) {
    %c0_i32 = arith.constant 0 : i32
    %c0_i32_0 = arith.constant 0 : i32
    %c0_i32_1 = arith.constant 0 : i32
    %c0_i32_2 = arith.constant 0 : i32
    return %c0_i32, %c0_i32_0, %c0_i32_1 : i32, i32, i32
  }
  func.func @transform_35(%arg0: i32) -> (i32, i32, i32) {
    %c0_i32 = arith.constant 0 : i32
    %c0_i32_0 = arith.constant 0 : i32
    %c0_i32_1 = arith.constant 0 : i32
    %c0_i32_2 = arith.constant 0 : i32
    return %c0_i32, %c0_i32_0, %c0_i32_1 : i32, i32, i32
  }
  func.func @transform_36(%arg0: i32) -> (i32, i32, i32) {
    %c0_i32 = arith.constant 0 : i32
    %c0_i32_0 = arith.constant 0 : i32
    %c0_i32_1 = arith.constant 0 : i32
    %c0_i32_2 = arith.constant 0 : i32
    return %c0_i32, %c0_i32_0, %c0_i32_1 : i32, i32, i32
  }
  func.func @transform_37(%arg0: i32) -> (i32, i32, i32) {
    %c0_i32 = arith.constant 0 : i32
    %c0_i32_0 = arith.constant 0 : i32
    %c0_i32_1 = arith.constant 0 : i32
    %c0_i32_2 = arith.constant 0 : i32
    return %c0_i32, %c0_i32_0, %c0_i32_1 : i32, i32, i32
  }
  func.func @transform_38(%arg0: i32) -> (i32, i32, i32) {
    %c0_i32 = arith.constant 0 : i32
    %c0_i32_0 = arith.constant 0 : i32
    %c0_i32_1 = arith.constant 0 : i32
    %c0_i32_2 = arith.constant 0 : i32
    return %c0_i32, %c0_i32_0, %c0_i32_1 : i32, i32, i32
  }
  func.func @transform_39(%arg0: i32) -> (i32, i32, i32) {
    %c0_i32 = arith.constant 0 : i32
    %c0_i32_0 = arith.constant 0 : i32
    %c0_i32_1 = arith.constant 0 : i32
    %c0_i32_2 = arith.constant 0 : i32
    return %c0_i32, %c0_i32_0, %c0_i32_1 : i32, i32, i32
  }
  func.func @transform_40(%arg0: i32) -> (i32, i32, i32) {
    %c0_i32 = arith.constant 0 : i32
    %c0_i32_0 = arith.constant 0 : i32
    %c0_i32_1 = arith.constant 0 : i32
    %c0_i32_2 = arith.constant 0 : i32
    return %c0_i32, %c0_i32_0, %c0_i32_1 : i32, i32, i32
  }
  func.func @transform_41(%arg0: i32) -> (i32, i32, i32) {
    %c0_i32 = arith.constant 0 : i32
    %c0_i32_0 = arith.constant 0 : i32
    %c0_i32_1 = arith.constant 0 : i32
    %c0_i32_2 = arith.constant 0 : i32
    return %c0_i32, %c0_i32_0, %c0_i32_1 : i32, i32, i32
  }
  func.func @transform_42(%arg0: i32) -> (i32, i32, i32) {
    %c0_i32 = arith.constant 0 : i32
    %c0_i32_0 = arith.constant 0 : i32
    %c0_i32_1 = arith.constant 0 : i32
    %c0_i32_2 = arith.constant 0 : i32
    return %c0_i32, %c0_i32_0, %c0_i32_1 : i32, i32, i32
  }
  func.func @transform_43(%arg0: i32) -> (i32, i32, i32) {
    %c0_i32 = arith.constant 0 : i32
    %c0_i32_0 = arith.constant 0 : i32
    %c0_i32_1 = arith.constant 0 : i32
    %c0_i32_2 = arith.constant 0 : i32
    return %c0_i32, %c0_i32_0, %c0_i32_1 : i32, i32, i32
  }
  func.func @transform_44(%arg0: i32) -> (i32, i32) {
    %c0_i32 = arith.constant 0 : i32
    %c0_i32_0 = arith.constant 0 : i32
    %c0_i32_1 = arith.constant 0 : i32
    return %c0_i32, %c0_i32_0 : i32, i32
  }
}

</mosaic_0001>

<bundles_post_ra>
// kernel: tile.9
= control target key start
LH: loop header
LB: loop body
LE: loop exit
PB: predicated region body
PF: predicated region fallthrough
CT: control target
= control target key end

     0   :  { %vm3_vm0 = vcmask 261120   ;;  %s60_s0 = inlined_call_operand.vmem [shape: f32[2,10,32], index: 0, kind: input, shape index: {}]   ;;  %s61_s1 = inlined_call_operand.vmem [shape: f32[20,32], index: 1, kind: output, shape index: {}]  }
   0x1   :  { %v2_v0 = vld [vmem:[%s60_s0] sm:$0xff]   ;;  %v20_v1 = vld [vmem:[%s60_s0 + $0x8] sm:$0x3]   ;;  %v22_v2 = vld [vmem:[%s60_s0 + $0x10] sm:$0xff]  }
   0x2   :  { %4 = vst.msk [vmem:[%s61_s1] sm:$0xff] %vm3_vm0, %v2_v0   ;;  %21 = vst.msk [vmem:[%s61_s1 + $0x8] sm:$0x3] %vm3_vm0, %v20_v1   ;;  %v24_v3 = vld [vmem:[%s60_s0 + $0x18] sm:$0x3]  }
   0x3   :  { %23 = vst.msk [vmem:[%s61_s1 + $0xa] sm:$0xff] %vm3_vm0, %v22_v2   ;;  %25 = vst.msk [vmem:[%s61_s1 + $0x12] sm:$0x3] %vm3_vm0, %v24_v3  }

</bundles_post_ra>
